<compile_context>
chip_gen: v5e
topology: v5e:2x2
jax: 0.10.0
libtpu: 0.0.40
codegen_flags: <defaults>
</compile_context>

<pallas_src>
import math

import jax
import jax.numpy as jnp
from jax.experimental import pallas as pl
from jax.experimental.pallas import tpu as pltpu


def _make_kernel(num_heads: int, head_dim: int, channels: int, n: int, q_tile: int):
    hd, C, N, tq = head_dim, channels, n, q_tile

    def kernel(x_ref, wq_ref, bq_ref, wkv_ref, bkv_ref, wo_ref, bo_ref,
               out_ref, probs_ref,
               k_scr, v_scr, q_scr, ho_scr):
        q_idx = pl.program_id(1)
        h = pl.program_id(2)

        # ---- once per batch element: fused K/V projection for ALL heads --------
        # (N,C)@(C,2C) bf16 matmul, f32 accumulation; cached per-head in VMEM so
        # the projection is not repeated for every q-tile.
        @pl.when((q_idx == 0) & (h == 0))
        def _():
            xf = x_ref[0]                                            # (N, C) bf16
            kv = jnp.dot(xf, wkv_ref[...],
                         preferred_element_type=jnp.float32) + bkv_ref[...]
            kv = kv.astype(k_scr.dtype)                              # (N, 2C) bf16
            # Static scatter into per-head, leading-axis-indexed caches; the
            # sub-128-lane slicing cost is paid once here, not in the hot loop.
            for i in range(num_heads):
                k_scr[i] = kv[:, i * hd:(i + 1) * hd]
                v_scr[i] = kv[:, C + i * hd:C + (i + 1) * hd]

        # ---- once per q-tile: fused Q projection for ALL heads ------------------
        # 1/sqrt(head_dim) is folded into Wq / bq in the wrapper.
        @pl.when(h == 0)
        def _():
            row0 = pl.multiple_of(q_idx * tq, tq)
            xq = x_ref[0, pl.ds(row0, tq), :]                        # (tq, C) bf16
            q_all = jnp.dot(xq, wq_ref[...],
                            preferred_element_type=jnp.float32) + bq_ref[...]
            q_all = q_all.astype(q_scr.dtype)                        # (tq, C) bf16
            for i in range(num_heads):
                q_scr[i] = q_all[:, i * hd:(i + 1) * hd]

        # ---- per head: attention core (scores -> softmax -> P @ V) -------------
        qh = q_scr[h]                                                # (tq, hd) bf16
        kh = k_scr[h]                                                # (N,  hd) bf16
        vh = v_scr[h]                                                # (N,  hd) bf16

        scores = jax.lax.dot_general(                                # (tq, N) f32
            qh, kh, (((1,), (1,)), ((), ())),
            preferred_element_type=jnp.float32)

        m = jnp.max(scores, axis=-1, keepdims=True)
        e = jnp.exp(scores - m)
        denom = jnp.sum(e, axis=-1, keepdims=True)
        # Exact reciprocal on the (tq,1) row sums (cheap) so prob rows sum to 1;
        # probs are returned by the module, so no approx-EUP reciprocal here.
        probs = e * (1.0 / denom)                                    # (tq, N) f32
        # TODO(synk): nn.Dropout(0.1) on attn_probs is identity here (eval mode);
        # the optional `mask` argument of the PyTorch forward is not implemented.
        probs_ref[0, 0] = probs

        ho_scr[h] = jnp.dot(probs.astype(vh.dtype), vh,              # (tq, hd)
                            preferred_element_type=jnp.float32).astype(ho_scr.dtype)

        # ---- at the last head: single fused output projection across heads -----
        @pl.when(h == num_heads - 1)
        def _():
            head_cat = jnp.concatenate(
                [ho_scr[i] for i in range(num_heads)], axis=-1)      # (tq, C) bf16
            out_ref[0] = jnp.dot(head_cat, wo_ref[...],
                                 preferred_element_type=jnp.float32) + bo_ref[...]

    return kernel


def _pick_q_tile(n: int) -> int:
    """Query-row tile: prefer 256 (smaller f32 score/exp/prob intermediates; the K/V
    cache removes the incentive to amortize projections over huge tiles)."""
    for cand in (256, 128, 512):
        if n > cand and n % cand == 0:
            return cand
    return n


def _pack_params(params, inv_scale):
    """Weights -> bf16 matmul operands; biases stay f32 (added to f32 accumulators).
    1/sqrt(head_dim) folded into the Q projection; K|V fused along output channels."""
    wq = (params["wq_t"] * inv_scale).astype(jnp.bfloat16)                  # (C, C)
    bq = params["bq"] * inv_scale                                           # (1, C)  f32
    wkv = jnp.concatenate([params["wk_t"], params["wv_t"]],
                          axis=1).astype(jnp.bfloat16)                      # (C, 2C)
    bkv = jnp.concatenate([params["bk"], params["bv"]], axis=1)             # (1, 2C) f32
    wo = params["wo_t"].astype(jnp.bfloat16)                                # (C, C)
    bo = params["bo"]                                                       # (1, C)  f32
    return wq, bq, wkv, bkv, wo, bo


def spatial_attention_pallas(x_nchw, params, num_heads, *, q_tile=None):
    """x_nchw: (B, C, H, W) f32.  Returns (out (B,C,H,W) f32, attn_probs (B,heads,N,N) f32)."""
    B, C, H, W = x_nchw.shape
    N = H * W
    assert C % num_heads == 0
    hd = C // num_heads
    inv_scale = 1.0 / math.sqrt(hd)

    tq = q_tile if q_tile is not None else _pick_q_tile(N)
    assert N % tq == 0
    num_q = N // tq

    # NCHW -> channels-last (B, N, C), bf16: every 1x1 conv is an MXU matmul at
    # native bf16 rate and the resident x block takes half the VMEM.
    x_bnc = jnp.transpose(x_nchw.reshape(B, C, N), (0, 2, 1)).astype(jnp.bfloat16)
    wq, bq, wkv, bkv, wo, bo = _pack_params(params, inv_scale)

    kernel = _make_kernel(num_heads, hd, C, N, tq)

    out_bnc, probs = pl.pallas_call(
        kernel,
        out_shape=(
            jax.ShapeDtypeStruct((B, N, C), jnp.float32),
            jax.ShapeDtypeStruct((B, num_heads, N, N), jnp.float32),
        ),
        grid_spec=pltpu.PrefetchScalarGridSpec(
            num_scalar_prefetch=0,
            grid=(B, num_q, num_heads),
            in_specs=[
                # resident x block (K/V + Q source); index ignores q/h so it is only
                # re-fetched when the batch index changes.
                pl.BlockSpec((1, N, C), lambda b, q, h: (b, 0, 0)),
                pl.BlockSpec((C, C), lambda b, q, h: (0, 0)),          # Wq (scaled)
                pl.BlockSpec((1, C), lambda b, q, h: (0, 0)),          # bq (scaled)
                pl.BlockSpec((C, 2 * C), lambda b, q, h: (0, 0)),      # [Wk | Wv]
                pl.BlockSpec((1, 2 * C), lambda b, q, h: (0, 0)),      # [bk | bv]
                pl.BlockSpec((C, C), lambda b, q, h: (0, 0)),          # Wo
                pl.BlockSpec((1, C), lambda b, q, h: (0, 0)),          # bo
            ],
            out_specs=[
                # out block revisited across the head axis; written at the last head
                pl.BlockSpec((1, tq, C), lambda b, q, h: (b, q, 0)),
                # attention probs: lane-dense last dim (N), one (tq, N) tile per step
                pl.BlockSpec((1, 1, tq, N), lambda b, q, h: (b, h, q, 0)),
            ],
            scratch_shapes=[
                pltpu.VMEM((num_heads, N, hd), jnp.bfloat16),    # K cache (per batch)
                pltpu.VMEM((num_heads, N, hd), jnp.bfloat16),    # V cache (per batch)
                pltpu.VMEM((num_heads, tq, hd), jnp.bfloat16),   # Q cache (per q-tile)
                pltpu.VMEM((num_heads, tq, hd), jnp.bfloat16),   # per-head attn outputs
            ],
        ),
        compiler_params=pltpu.CompilerParams(
            # q and head axes carry VMEM-scratch state across steps -> "arbitrary"
            # (sequential per core); batch is independent -> "parallel" (megacore).
            dimension_semantics=("parallel", "arbitrary", "arbitrary"),
        ),
    )(x_bnc, wq, bq, wkv, bkv, wo, bo)

    out_nchw = jnp.transpose(out_bnc, (0, 2, 1)).reshape(B, C, H, W)
    return out_nchw, probs


def spatial_attention_ref(x_nchw, params, num_heads):
    """Pure-JAX f32 reference mirroring the PyTorch forward (eval mode, mask=None)."""
    B, C, H, W = x_nchw.shape
    N = H * W
    head_dim = C // num_heads
    scale = math.sqrt(head_dim)

    x = jnp.transpose(x_nchw.reshape(B, C, N), (0, 2, 1))       # (B, N, C)
    q = x @ params["wq_t"] + params["bq"][0]
    k = x @ params["wk_t"] + params["bk"][0]
    v = x @ params["wv_t"] + params["bv"][0]

    def split(t):                                               # (B,N,C)->(B,heads,N,hd)
        return jnp.transpose(t.reshape(B, N, num_heads, head_dim), (0, 2, 1, 3))
    qh, kh, vh = split(q), split(k), split(v)

    scores = jnp.einsum("bhnd,bhmd->bhnm", qh, kh) / scale
    probs = jax.nn.softmax(scores, axis=-1)
    o = jnp.einsum("bhnm,bhmd->bhnd", probs, vh)                # (B, heads, N, hd)
    o = jnp.transpose(o, (0, 2, 1, 3)).reshape(B, N, C)
    out = o @ params["wo_t"] + params["bo"][0]
    out = jnp.transpose(out, (0, 2, 1)).reshape(B, C, H, W)
    return out, probs


if __name__ == "__main__":
    B, C, H, W = 2, 8, 16, 16          # N = 256 -> q-tile 128, grid (2, 2, 2)
    num_heads = 2

    key = jax.random.PRNGKey(0)
    ks = jax.random.split(key, 9)
    x = jax.random.normal(ks[0], (B, C, H, W), dtype=jnp.float32)

    # PyTorch Conv2d(k=1) weight is (C_out, C_in, 1, 1); we store the transposed
    # (C_in, C_out) matrix so each projection is y = x @ W^T + b.
    def wmat(k):
        return jax.random.normal(k, (C, C), dtype=jnp.float32) * 0.3

    def bvec(k):
        return jax.random.normal(k, (1, C), dtype=jnp.float32) * 0.05

    params = dict(
        wq_t=wmat(ks[1]), wk_t=wmat(ks[2]), wv_t=wmat(ks[3]), wo_t=wmat(ks[4]),
        bq=bvec(ks[5]), bk=bvec(ks[6]), bv=bvec(ks[7]), bo=bvec(ks[8]),
    )

    out, probs = spatial_attention_pallas(x, params, num_heads)
    out, probs = jax.block_until_ready((out, probs))

    ref_out, ref_probs = spatial_attention_ref(x, params, num_heads)
    assert out.shape == (B, C, H, W)
    assert probs.shape == (B, num_heads, H * W, H * W)
    # tolerances account for bf16 matmul operands (with f32 accumulation) vs f32 ref
    assert jnp.allclose(probs, ref_probs, atol=3e-3, rtol=3e-3), \
        float(jnp.max(jnp.abs(probs - ref_probs)))
    assert jnp.allclose(out, ref_out, atol=1e-2, rtol=2e-2), \
        float(jnp.max(jnp.abs(out - ref_out)))

    print("KERNEL_OK")
</pallas_src>

<mosaic_0001>
module attributes {stable_mosaic.version = 11 : i64} {
  func.func @kernel(%arg0: i32, %arg1: i32, %arg2: i32, %arg3: memref<1x256x8xbf16, #tpu.memory_space<vmem>>, %arg4: memref<8x8xbf16, #tpu.memory_space<vmem>>, %arg5: memref<1x8xf32, #tpu.memory_space<vmem>>, %arg6: memref<8x16xbf16, #tpu.memory_space<vmem>>, %arg7: memref<1x16xf32, #tpu.memory_space<vmem>>, %arg8: memref<8x8xbf16, #tpu.memory_space<vmem>>, %arg9: memref<1x8xf32, #tpu.memory_space<vmem>>, %arg10: memref<1x128x8xf32, #tpu.memory_space<vmem>>, %arg11: memref<1x1x128x256xf32, #tpu.memory_space<vmem>>, %arg12: memref<2x256x4xbf16, #tpu.memory_space<vmem>>, %arg13: memref<2x256x4xbf16, #tpu.memory_space<vmem>>, %arg14: memref<2x128x4xbf16, #tpu.memory_space<vmem>>, %arg15: memref<2x128x4xbf16, #tpu.memory_space<vmem>>) attributes {dimension_semantics = [#tpu.dimension_semantics<parallel>, #tpu.dimension_semantics<arbitrary>, #tpu.dimension_semantics<arbitrary>], iteration_bounds = array<i64: 2, 2, 2>, scalar_prefetch = 0 : i64, scratch_operands = 4 : i64, tpu.core_type = #tpu.core_type<tc>, window_params = [{transform_indices = @transform_0, window_bounds = array<i64: 1, 256, 8>}, {pipeline_mode = #tpu.pipeline_mode<synchronous>, transform_indices = @transform_1, window_bounds = array<i64: 8, 8>}, {pipeline_mode = #tpu.pipeline_mode<synchronous>, transform_indices = @transform_2, window_bounds = array<i64: 1, 8>}, {pipeline_mode = #tpu.pipeline_mode<synchronous>, transform_indices = @transform_3, window_bounds = array<i64: 8, 16>}, {pipeline_mode = #tpu.pipeline_mode<synchronous>, transform_indices = @transform_4, window_bounds = array<i64: 1, 16>}, {pipeline_mode = #tpu.pipeline_mode<synchronous>, transform_indices = @transform_5, window_bounds = array<i64: 8, 8>}, {pipeline_mode = #tpu.pipeline_mode<synchronous>, transform_indices = @transform_6, window_bounds = array<i64: 1, 8>}, {transform_indices = @transform_7, window_bounds = array<i64: 1, 128, 8>}, {transform_indices = @transform_8, window_bounds = array<i64: 1, 1, 128, 256>}]} {
    %c0_i32 = arith.constant 0 : i32
    %0 = arith.cmpi eq, %arg1, %c0_i32 : i32
    %c0_i32_0 = arith.constant 0 : i32
    %1 = arith.cmpi eq, %arg2, %c0_i32_0 : i32
    %2 = arith.andi %0, %1 : i1
    %3 = arith.extui %2 : i1 to i32
    %c0_i32_1 = arith.constant 0 : i32
    %4 = arith.cmpi ne, %3, %c0_i32_1 : i32
    scf.if %4 {
      %c0_20 = arith.constant 0 : index
      %c0_21 = arith.constant 0 : index
      %c0_22 = arith.constant 0 : index
      %42 = vector.load %arg3[%c0_20, %c0_21, %c0_22] : memref<1x256x8xbf16, #tpu.memory_space<vmem>>, vector<1x256x8xbf16>
      %43 = vector.shape_cast %42 : vector<1x256x8xbf16> to vector<256x8xbf16>
      %c0_23 = arith.constant 0 : index
      %c0_24 = arith.constant 0 : index
      %44 = vector.load %arg6[%c0_23, %c0_24] : memref<8x16xbf16, #tpu.memory_space<vmem>>, vector<8x16xbf16>
      %cst_25 = arith.constant dense<0.000000e+00> : vector<256x16xf32>
      %45 = tpu.matmul %43, %44, %cst_25 {dimension_numbers = #tpu.dot_dimension_numbers<[1], [0], [0], [1], [0, 0, 1, 1], [], []>} : vector<256x8xbf16>, vector<8x16xbf16>, vector<256x16xf32> -> vector<256x16xf32>
      %c0_26 = arith.constant 0 : index
      %c0_27 = arith.constant 0 : index
      %46 = vector.load %arg7[%c0_26, %c0_27] : memref<1x16xf32, #tpu.memory_space<vmem>>, vector<1x16xf32>
      %47 = vector.broadcast %46 : vector<1x16xf32> to vector<256x16xf32>
      %48 = arith.addf %45, %47 : vector<256x16xf32>
      %49 = arith.truncf %48 : vector<256x16xf32> to vector<256x16xbf16>
      %50 = vector.extract_strided_slice %49 {offsets = [0, 0], sizes = [256, 4], strides = [1, 1]} : vector<256x16xbf16> to vector<256x4xbf16>
      %c0_28 = arith.constant 0 : index
      %c0_29 = arith.constant 0 : index
      %c0_30 = arith.constant 0 : index
      %51 = vector.load %arg12[%c0_28, %c0_29, %c0_30] : memref<2x256x4xbf16, #tpu.memory_space<vmem>>, vector<1x256x4xbf16>
      %52 = vector.shape_cast %51 : vector<1x256x4xbf16> to vector<256x4xbf16>
      %53 = vector.shape_cast %50 : vector<256x4xbf16> to vector<1x256x4xbf16>
      tpu.vector_store %arg12[%c0_28, %c0_29, %c0_30], %53 {strides = array<i32>} : memref<2x256x4xbf16, #tpu.memory_space<vmem>>, vector<1x256x4xbf16>,
      %54 = vector.extract_strided_slice %49 {offsets = [0, 8], sizes = [256, 4], strides = [1, 1]} : vector<256x16xbf16> to vector<256x4xbf16>
      %c0_31 = arith.constant 0 : index
      %c0_32 = arith.constant 0 : index
      %c0_33 = arith.constant 0 : index
      %55 = vector.load %arg13[%c0_31, %c0_32, %c0_33] : memref<2x256x4xbf16, #tpu.memory_space<vmem>>, vector<1x256x4xbf16>
      %56 = vector.shape_cast %55 : vector<1x256x4xbf16> to vector<256x4xbf16>
      %57 = vector.shape_cast %54 : vector<256x4xbf16> to vector<1x256x4xbf16>
      tpu.vector_store %arg13[%c0_31, %c0_32, %c0_33], %57 {strides = array<i32>} : memref<2x256x4xbf16, #tpu.memory_space<vmem>>, vector<1x256x4xbf16>,
      %58 = vector.extract_strided_slice %49 {offsets = [0, 4], sizes = [256, 4], strides = [1, 1]} : vector<256x16xbf16> to vector<256x4xbf16>
      %c1 = arith.constant 1 : index
      %c0_34 = arith.constant 0 : index
      %c0_35 = arith.constant 0 : index
      %59 = vector.load %arg12[%c1, %c0_34, %c0_35] : memref<2x256x4xbf16, #tpu.memory_space<vmem>>, vector<1x256x4xbf16>
      %60 = vector.shape_cast %59 : vector<1x256x4xbf16> to vector<256x4xbf16>
      %61 = vector.shape_cast %58 : vector<256x4xbf16> to vector<1x256x4xbf16>
      tpu.vector_store %arg12[%c1, %c0_34, %c0_35], %61 {strides = array<i32>} : memref<2x256x4xbf16, #tpu.memory_space<vmem>>, vector<1x256x4xbf16>,
      %62 = vector.extract_strided_slice %49 {offsets = [0, 12], sizes = [256, 4], strides = [1, 1]} : vector<256x16xbf16> to vector<256x4xbf16>
      %c1_36 = arith.constant 1 : index
      %c0_37 = arith.constant 0 : index
      %c0_38 = arith.constant 0 : index
      %63 = vector.load %arg13[%c1_36, %c0_37, %c0_38] : memref<2x256x4xbf16, #tpu.memory_space<vmem>>, vector<1x256x4xbf16>
      %64 = vector.shape_cast %63 : vector<1x256x4xbf16> to vector<256x4xbf16>
      %65 = vector.shape_cast %62 : vector<256x4xbf16> to vector<1x256x4xbf16>
      tpu.vector_store %arg13[%c1_36, %c0_37, %c0_38], %65 {strides = array<i32>} : memref<2x256x4xbf16, #tpu.memory_space<vmem>>, vector<1x256x4xbf16>,
    } else {
    }
    %c0_i32_2 = arith.constant 0 : i32
    %5 = arith.cmpi eq, %arg2, %c0_i32_2 : i32
    %6 = arith.extui %5 : i1 to i32
    %c0_i32_3 = arith.constant 0 : i32
    %7 = arith.cmpi ne, %6, %c0_i32_3 : i32
    scf.if %7 {
      %c128_i32 = arith.constant 128 : i32
      %42 = arith.muli %arg1, %c128_i32 : i32
      %43 = tpu.assume_multiple %42, 128 : i32
      %c0_20 = arith.constant 0 : index
      %44 = arith.index_cast %43 : i32 to index
      %c0_21 = arith.constant 0 : index
      %45 = vector.load %arg3[%c0_20, %44, %c0_21] : memref<1x256x8xbf16, #tpu.memory_space<vmem>>, vector<1x128x8xbf16>
      %46 = vector.shape_cast %45 : vector<1x128x8xbf16> to vector<128x8xbf16>
      %c0_22 = arith.constant 0 : index
      %c0_23 = arith.constant 0 : index
      %47 = vector.load %arg4[%c0_22, %c0_23] : memref<8x8xbf16, #tpu.memory_space<vmem>>, vector<8x8xbf16>
      %cst_24 = arith.constant dense<0.000000e+00> : vector<128x8xf32>
      %48 = tpu.matmul %46, %47, %cst_24 {dimension_numbers = #tpu.dot_dimension_numbers<[1], [0], [0], [1], [0, 0, 1, 1], [], []>} : vector<128x8xbf16>, vector<8x8xbf16>, vector<128x8xf32> -> vector<128x8xf32>
      %c0_25 = arith.constant 0 : index
      %c0_26 = arith.constant 0 : index
      %49 = vector.load %arg5[%c0_25, %c0_26] : memref<1x8xf32, #tpu.memory_space<vmem>>, vector<1x8xf32>
      %50 = vector.broadcast %49 : vector<1x8xf32> to vector<128x8xf32>
      %51 = arith.addf %48, %50 : vector<128x8xf32>
      %52 = arith.truncf %51 : vector<128x8xf32> to vector<128x8xbf16>
      %53 = vector.extract_strided_slice %52 {offsets = [0, 0], sizes = [128, 4], strides = [1, 1]} : vector<128x8xbf16> to vector<128x4xbf16>
      %c0_27 = arith.constant 0 : index
      %c0_28 = arith.constant 0 : index
      %c0_29 = arith.constant 0 : index
      %54 = vector.load %arg14[%c0_27, %c0_28, %c0_29] : memref<2x128x4xbf16, #tpu.memory_space<vmem>>, vector<1x128x4xbf16>
      %55 = vector.shape_cast %54 : vector<1x128x4xbf16> to vector<128x4xbf16>
      %56 = vector.shape_cast %53 : vector<128x4xbf16> to vector<1x128x4xbf16>
      tpu.vector_store %arg14[%c0_27, %c0_28, %c0_29], %56 {strides = array<i32>} : memref<2x128x4xbf16, #tpu.memory_space<vmem>>, vector<1x128x4xbf16>,
      %57 = vector.extract_strided_slice %52 {offsets = [0, 4], sizes = [128, 4], strides = [1, 1]} : vector<128x8xbf16> to vector<128x4xbf16>
      %c1 = arith.constant 1 : index
      %c0_30 = arith.constant 0 : index
      %c0_31 = arith.constant 0 : index
      %58 = vector.load %arg14[%c1, %c0_30, %c0_31] : memref<2x128x4xbf16, #tpu.memory_space<vmem>>, vector<1x128x4xbf16>
      %59 = vector.shape_cast %58 : vector<1x128x4xbf16> to vector<128x4xbf16>
      %60 = vector.shape_cast %57 : vector<128x4xbf16> to vector<1x128x4xbf16>
      tpu.vector_store %arg14[%c1, %c0_30, %c0_31], %60 {strides = array<i32>} : memref<2x128x4xbf16, #tpu.memory_space<vmem>>, vector<1x128x4xbf16>,
    } else {
    }
    %8 = arith.index_cast %arg2 : i32 to index
    %c0 = arith.constant 0 : index
    %c0_4 = arith.constant 0 : index
    %9 = vector.load %arg14[%8, %c0, %c0_4] : memref<2x128x4xbf16, #tpu.memory_space<vmem>>, vector<1x128x4xbf16>
    %10 = vector.shape_cast %9 : vector<1x128x4xbf16> to vector<128x4xbf16>
    %11 = arith.index_cast %arg2 : i32 to index
    %c0_5 = arith.constant 0 : index
    %c0_6 = arith.constant 0 : index
    %12 = vector.load %arg12[%11, %c0_5, %c0_6] : memref<2x256x4xbf16, #tpu.memory_space<vmem>>, vector<1x256x4xbf16>
    %13 = vector.shape_cast %12 : vector<1x256x4xbf16> to vector<256x4xbf16>
    %14 = arith.index_cast %arg2 : i32 to index
    %c0_7 = arith.constant 0 : index
    %c0_8 = arith.constant 0 : index
    %15 = vector.load %arg13[%14, %c0_7, %c0_8] : memref<2x256x4xbf16, #tpu.memory_space<vmem>>, vector<1x256x4xbf16>
    %16 = vector.shape_cast %15 : vector<1x256x4xbf16> to vector<256x4xbf16>
    %cst = arith.constant dense<0.000000e+00> : vector<128x256xf32>
    %17 = tpu.matmul %10, %13, %cst {dimension_numbers = #tpu.dot_dimension_numbers<[1], [1], [0], [0], [0, 0, 1, 0], [], []>} : vector<128x4xbf16>, vector<256x4xbf16>, vector<128x256xf32> -> vector<128x256xf32>
    %cst_9 = arith.constant dense<0xFF800000> : vector<128xf32>
    %18 = vector.multi_reduction <maximumf>, %17, %cst_9 [1] : vector<128x256xf32> to vector<128xf32>
    %19 = vector.shape_cast %18 : vector<128xf32> to vector<128x1xf32>
    %20 = vector.broadcast %19 : vector<128x1xf32> to vector<128x256xf32>
    %21 = arith.subf %17, %20 : vector<128x256xf32>
    %22 = math.exp %21 : vector<128x256xf32>
    %cst_10 = arith.constant dense<0.000000e+00> : vector<128xf32>
    %23 = vector.multi_reduction <add>, %22, %cst_10 [1] : vector<128x256xf32> to vector<128xf32>
    %24 = vector.shape_cast %23 : vector<128xf32> to vector<128x1xf32>
    %cst_11 = arith.constant 1.000000e+00 : f32
    %25 = vector.broadcast %cst_11 : f32 to vector<128x1xf32>
    %26 = arith.divf %25, %24 : vector<128x1xf32>
    %27 = vector.broadcast %26 : vector<128x1xf32> to vector<128x256xf32>
    %28 = arith.mulf %22, %27 : vector<128x256xf32>
    %c0_12 = arith.constant 0 : index
    %c0_13 = arith.constant 0 : index
    %c0_14 = arith.constant 0 : index
    %c0_15 = arith.constant 0 : index
    %29 = vector.load %arg11[%c0_12, %c0_13, %c0_14, %c0_15] : memref<1x1x128x256xf32, #tpu.memory_space<vmem>>, vector<1x1x128x256xf32>
    %30 = vector.shape_cast %29 : vector<1x1x128x256xf32> to vector<128x256xf32>
    %31 = vector.shape_cast %28 : vector<128x256xf32> to vector<1x1x128x256xf32>
    tpu.vector_store %arg11[%c0_12, %c0_13, %c0_14, %c0_15], %31 {strides = array<i32>} : memref<1x1x128x256xf32, #tpu.memory_space<vmem>>, vector<1x1x128x256xf32>,
    %32 = arith.truncf %28 : vector<128x256xf32> to vector<128x256xbf16>
    %cst_16 = arith.constant dense<0.000000e+00> : vector<128x4xf32>
    %33 = tpu.matmul %32, %16, %cst_16 {dimension_numbers = #tpu.dot_dimension_numbers<[1], [0], [0], [1], [0, 0, 1, 1], [], []>} : vector<128x256xbf16>, vector<256x4xbf16>, vector<128x4xf32> -> vector<128x4xf32>
    %34 = arith.truncf %33 : vector<128x4xf32> to vector<128x4xbf16>
    %35 = arith.index_cast %arg2 : i32 to index
    %c0_17 = arith.constant 0 : index
    %c0_18 = arith.constant 0 : index
    %36 = vector.load %arg15[%35, %c0_17, %c0_18] : memref<2x128x4xbf16, #tpu.memory_space<vmem>>, vector<1x128x4xbf16>
    %37 = vector.shape_cast %36 : vector<1x128x4xbf16> to vector<128x4xbf16>
    %38 = vector.shape_cast %34 : vector<128x4xbf16> to vector<1x128x4xbf16>
    tpu.vector_store %arg15[%35, %c0_17, %c0_18], %38 {strides = array<i32>} : memref<2x128x4xbf16, #tpu.memory_space<vmem>>, vector<1x128x4xbf16>,
    %c1_i32 = arith.constant 1 : i32
    %39 = arith.cmpi eq, %arg2, %c1_i32 : i32
    %40 = arith.extui %39 : i1 to i32
    %c0_i32_19 = arith.constant 0 : i32
    %41 = arith.cmpi ne, %40, %c0_i32_19 : i32
    scf.if %41 {
      %c0_20 = arith.constant 0 : index
      %c0_21 = arith.constant 0 : index
      %c0_22 = arith.constant 0 : index
      %42 = vector.load %arg15[%c0_20, %c0_21, %c0_22] : memref<2x128x4xbf16, #tpu.memory_space<vmem>>, vector<1x128x4xbf16>
      %43 = vector.shape_cast %42 : vector<1x128x4xbf16> to vector<128x4xbf16>
      %c1 = arith.constant 1 : index
      %c0_23 = arith.constant 0 : index
      %c0_24 = arith.constant 0 : index
      %44 = vector.load %arg15[%c1, %c0_23, %c0_24] : memref<2x128x4xbf16, #tpu.memory_space<vmem>>, vector<1x128x4xbf16>
      %45 = vector.shape_cast %44 : vector<1x128x4xbf16> to vector<128x4xbf16>
      %46 = tpu.concatenate %43, %45 in 1 : vector<128x4xbf16>, vector<128x4xbf16> -> vector<128x8xbf16>
      %c0_25 = arith.constant 0 : index
      %c0_26 = arith.constant 0 : index
      %47 = vector.load %arg8[%c0_25, %c0_26] : memref<8x8xbf16, #tpu.memory_space<vmem>>, vector<8x8xbf16>
      %cst_27 = arith.constant dense<0.000000e+00> : vector<128x8xf32>
      %48 = tpu.matmul %46, %47, %cst_27 {dimension_numbers = #tpu.dot_dimension_numbers<[1], [0], [0], [1], [0, 0, 1, 1], [], []>} : vector<128x8xbf16>, vector<8x8xbf16>, vector<128x8xf32> -> vector<128x8xf32>
      %c0_28 = arith.constant 0 : index
      %c0_29 = arith.constant 0 : index
      %49 = vector.load %arg9[%c0_28, %c0_29] : memref<1x8xf32, #tpu.memory_space<vmem>>, vector<1x8xf32>
      %50 = vector.broadcast %49 : vector<1x8xf32> to vector<128x8xf32>
      %51 = arith.addf %48, %50 : vector<128x8xf32>
      %c0_30 = arith.constant 0 : index
      %c0_31 = arith.constant 0 : index
      %c0_32 = arith.constant 0 : index
      %52 = vector.load %arg10[%c0_30, %c0_31, %c0_32] : memref<1x128x8xf32, #tpu.memory_space<vmem>>, vector<1x128x8xf32>
      %53 = vector.shape_cast %52 : vector<1x128x8xf32> to vector<128x8xf32>
      %54 = vector.shape_cast %51 : vector<128x8xf32> to vector<1x128x8xf32>
      tpu.vector_store %arg10[%c0_30, %c0_31, %c0_32], %54 {strides = array<i32>} : memref<1x128x8xf32, #tpu.memory_space<vmem>>, vector<1x128x8xf32>,
    } else {
    }
    return
  }
  func.func @transform_0(%arg0: i32, %arg1: i32, %arg2: i32) -> (i32, i32, i32) {
    %c0_i32 = arith.constant 0 : i32
    %c0_i32_0 = arith.constant 0 : i32
    %c0_i32_1 = arith.constant 0 : i32
    return %arg0, %c0_i32, %c0_i32_0 : i32, i32, i32
  }
  func.func @transform_1(%arg0: i32, %arg1: i32, %arg2: i32) -> (i32, i32) {
    %c0_i32 = arith.constant 0 : i32
    %c0_i32_0 = arith.constant 0 : i32
    %c0_i32_1 = arith.constant 0 : i32
    return %c0_i32, %c0_i32_0 : i32, i32
  }
  func.func @transform_2(%arg0: i32, %arg1: i32, %arg2: i32) -> (i32, i32) {
    %c0_i32 = arith.constant 0 : i32
    %c0_i32_0 = arith.constant 0 : i32
    %c0_i32_1 = arith.constant 0 : i32
    return %c0_i32, %c0_i32_0 : i32, i32
  }
  func.func @transform_3(%arg0: i32, %arg1: i32, %arg2: i32) -> (i32, i32) {
    %c0_i32 = arith.constant 0 : i32
    %c0_i32_0 = arith.constant 0 : i32
    %c0_i32_1 = arith.constant 0 : i32
    return %c0_i32, %c0_i32_0 : i32, i32
  }
  func.func @transform_4(%arg0: i32, %arg1: i32, %arg2: i32) -> (i32, i32) {
    %c0_i32 = arith.constant 0 : i32
    %c0_i32_0 = arith.constant 0 : i32
    %c0_i32_1 = arith.constant 0 : i32
    return %c0_i32, %c0_i32_0 : i32, i32
  }
  func.func @transform_5(%arg0: i32, %arg1: i32, %arg2: i32) -> (i32, i32) {
    %c0_i32 = arith.constant 0 : i32
    %c0_i32_0 = arith.constant 0 : i32
    %c0_i32_1 = arith.constant 0 : i32
    return %c0_i32, %c0_i32_0 : i32, i32
  }
  func.func @transform_6(%arg0: i32, %arg1: i32, %arg2: i32) -> (i32, i32) {
    %c0_i32 = arith.constant 0 : i32
    %c0_i32_0 = arith.constant 0 : i32
    %c0_i32_1 = arith.constant 0 : i32
    return %c0_i32, %c0_i32_0 : i32, i32
  }
  func.func @transform_7(%arg0: i32, %arg1: i32, %arg2: i32) -> (i32, i32, i32) {
    %c0_i32 = arith.constant 0 : i32
    %c0_i32_0 = arith.constant 0 : i32
    return %arg0, %arg1, %c0_i32 : i32, i32, i32
  }
  func.func @transform_8(%arg0: i32, %arg1: i32, %arg2: i32) -> (i32, i32, i32, i32) {
    %c0_i32 = arith.constant 0 : i32
    %c0_i32_0 = arith.constant 0 : i32
    return %arg0, %arg2, %arg1, %c0_i32 : i32, i32, i32, i32
  }
}

</mosaic_0001>

<bundles_post_ra>
// kernel: tpu_custom_call.1
= control target key start
LH: loop header
LB: loop body
LE: loop exit
PB: predicated region body
PF: predicated region fallthrough
CT: control target
= control target key end

     0   :  { %14 = vsyncpa [#allocation7], 0  ;;  %s4911_s0 = inlined_call_operand.vmem [shape: bf16[2,256,8], index: 0, kind: input, shape index: {}]   ;;  %s4912_s1 = inlined_call_operand.vmem [shape: bf16[8,8], index: 1, kind: input, shape index: {}]   ;;  %s4913_s2 = inlined_call_operand.vmem [shape: f32[1,8], index: 2, kind: input, shape index: {}]   ;;  %s4914_s3 = inlined_call_operand.vmem [shape: bf16[8,16], index: 3, kind: input, shape index: {}]   ;;  %s4915_s4 = inlined_call_operand.vmem [shape: f32[1,16], index: 4, kind: input, shape index: {}]   ;;  %s4916_s5 = inlined_call_operand.vmem [shape: bf16[8,8], index: 5, kind: input, shape index: {}]   ;;  %s4917_s6 = inlined_call_operand.vmem [shape: f32[1,8], index: 6, kind: input, shape index: {}]   ;;  %s4918_s7 = inlined_call_operand.vmem [shape: f32[2,256,8], index: 7, kind: output, shape index: {0}]   ;;  %s4919_s8 = inlined_call_operand.hbm [shape: f32[2,2,256,256], index: 8, kind: output, shape index: {1}]  }
   0x1   :  { %16 = vsyncpa [#allocation7 + $0x1], 0  ;;  %s3744_s27 = smov 0   ;;  %s3746_s28 = smov 0  }
   0x2   :  { %s3748_s29 = smov 0   ;;  %s3750_s30 = smov 0  }
   0x3   :  { %s3752_s9 = smov 0   ;;  %s3754_s10 = smov 0  }
   0x4   :  { %s3756_s11 = smov 0   ;;  %s3758_s12 = smov 0  }
   0x5   :  { %s3760_s13 = smov 0   ;;  %s3762_s14 = smov 0  }
   0x6 LB: > { %4929 = sst [smem:[#allocation9_spill]] %s3662_s29  ;;  %s2895_s15 = sadd.s32 4294967295, %s3690_s14   ;;  %s3690_s14 = sphi %s3762_s14, %s22_s14   ;;  %s3686_s13 = sphi %s3760_s13, %s4949_s13   ;;  %s3682_s12 = sphi %s3758_s12, %s4948_s12   ;;  %s3678_s11 = sphi %s3756_s11, %s4947_s11   ;;  %s3674_s10 = sphi %s3754_s10, %s4946_s10   ;;  %s3670_s9 = sphi %s3752_s9, %s4945_s9   ;;  %s3666_s30 = sphi %s3750_s30, %s4944_s30   ;;  %s3662_s29 = sphi %s3748_s29, %s4943_s29   ;;  %s3658_s28 = sphi %s3746_s28, %s4951_s28   ;;  %s3654_s27 = sphi %s3744_s27, %s4950_s27  }
   0x7   : > { %4930 = sst [smem:[#allocation10_spill]] %s3678_s11  ;;  %s34_s16 = sadd.s32 1, %s3678_s11 }
   0x8   : > { %4931 = sst [smem:[#allocation11_spill]] %s3682_s12  ;;  %p35_p0 = scmp.ge.s32.totalorder %s34_s16, 2 }
   0x9   : > { %4932 = sst [smem:[#allocation12_spill]] %s3686_s13  ;;  %s37_s17 = sadd.s32 1, %s3682_s12 }
   0xa   : > { %s2896_s18 = sadd.s32 4294967294, %s3690_s14   ;;  %p242_p1 = scmp.ne.s32.totalorder %s3662_s29, %s3658_s28 }
   0xb   : > { %s4953_s16 = smov (%p35_p0, %s34_s16), 0  ;;  %s4955_s17 = smov (!%p35_p0, %s37_s17), %s3682_s12 }
   0xc   : > { %4933 = sst [smem:[#allocation13_spill]] %s4953_s16  ;;  %s41_s19 = sadd.s32 1, %s3686_s13 }
   0xd   : > { %p243_p2 = scmp.eq.s32.totalorder %s2895_s15, 7  ;;  %p39_p3 = scmp.ge.s32.totalorder %s4955_s17, 2 }
   0xe   : > { %p248_p4 = scmp.ne.s32.totalorder %s3658_s28, %s3654_s27  ;;  %p249_p6 = scmp.eq.s32.totalorder %s2896_s18, 7 }
   0xf   : > { %p3806_p5 = por %p243_p2, %p242_p1  ;;  %s4957_s17 = smov (%p39_p3, %s4955_s17), 0 }
  0x10   : > { %4935 = sst [smem:[#allocation14_spill]] %s4957_s17  ;;  %s4959_s19 = smov (!%p39_p3, %s41_s19), %s3686_s13 }
  0x11   : > { %p3813_p7 = por %p249_p6, %p248_p4  ;;  %p43_p8 = scmp.ge.s32.totalorder %s4959_s19, 2 }
  0x12   : > { %p2899_p9 = scmp.ge.s32.totalorder %s3690_s14, 1  ;;  %s226_s22 = ssub.s32 %s3678_s11, %s4953_s16 }
  0x13   : > { %s4936_s21 = scalar_select %p3813_p7, 1, 0 }
  0x14   : > { %p293_p10 = scmp.lt.s32.totalorder %s3690_s14, 9  ;;  %s4961_s19 = smov (%p43_p8, %s4959_s19), 0 }
  0x15   : > { %4937 = sst [smem:[#allocation15_spill]] %s4936_s21  ;;  %s228_s23 = ssub.s32 %s3682_s12, %s4957_s17 }
  0x16   : > { %4938 = sst [smem:[#allocation16_spill]] %s4961_s19  ;;  %p294_p11 = pnand %p2899_p9, %p293_p10 }
  0x17   : > { %s225_s24 = ssub.s32 %s3686_s13, %s4961_s19  ;;  %s232_s15 = sadd.s32 1, %s3662_s29 }
  0x18   : > { %s227_s25 = sor.u32 %s226_s22, %s225_s24  ;;  %s4927_s16 = sand.u32 (!%p294_p11), 1, %s3658_s28  }
  0x19   : > { %s229_s26 = sor.u32 %s228_s23, %s227_s25  ;;  %p336_p13 = scmp.lt.s32.totalorder (!%p294_p11), %s3674_s10, 1 }
  0x1a   : > { %p230_p12 = scmp.eq.s32.totalorder %s229_s26, 0  ;;  %297 = sbr.rel (%p294_p11) target bundleno = 1950 (0x79e), region = 48 }
  0x1b   : > { %s2900_s17 = sshll.u32 (!%p294_p11), %s4927_s16, 8  ;;  %s2903_s12 = sshll.u32 (!%p294_p11), %s3670_s9, 4 }
  0x1c   : > { %s3829_s18 = scalar_select %p230_p12, %s3662_s29, %s232_s15  }
  0x1d   : > { %p344_p0 = scmp.lt.s32.totalorder (!%p294_p11), %s2903_s12, 31  ;;  %p353_p1 = scmp.eq.s32.totalorder (!%p294_p11), %s3670_s9, 0 }
  0x1e   : > { %4939 = sst [smem:[#allocation17_spill]] %s3829_s18  ;;  %p354_p2 = scmp.eq.s32.totalorder (!%p294_p11), %s3666_s30, 0 }
  0x1f   : > { %s337_s22 = scalar_select %p336_p13, %s3674_s10, 1 }
  0x20   : > { %s4963_s12 = smov (!%p344_p0, %s2903_s12), 31  ;;  %p355_p3 = pnand %p354_p2, %p353_p1 }
  0x21   : > { %s3292_s23 = sshll.u32 %s337_s22, 7  ;;  %s2904_s24 = sshll.u32 %s337_s22, 5 }
  0x22   : > { %s3840_s15 = scalar_lea.vmem %s4911_s0, %s3292_s23  ;;  %s347_s19 = sadd.s32 %s2904_s24, %s4963_s12 }
  0x23   : > { %s2905_s13 = sshll.u32 %s347_s19, 3  ;;  %s3849_s16 = scalar_lea.vmem [#allocation6], %s2900_s17 }
  0x24   : > { %s3846_s29 = scalar_lea.vmem %s4918_s7, %s2905_s13  ;;  %358 = sbr.rel (%p355_p3) target bundleno = 541 (0x21d), region = 52 }
  0x25   : > { %s3692_s13 = smov (!%p355_p3), 124   ;;  %s3693_s17 = smov (!%p355_p3), 120  }
  0x26   : > { %s3694_s19 = smov (!%p355_p3), 116  }
  0x29   : > { %v391_v0 = vld [vmem:[%s4914_s3] sm:$0xf]  ;;  %vm525_vm0 = vcmask 1043456   ;;  %vm476_vm1 = vcmask 64512   ;;  %v3294_v6 = vld [vmem:[%s3840_s15 + $0x8] sm:$0xff]  ;;  %v3295_v10 = vld [vmem:[%s3840_s15 + $0x10] sm:$0xff] }
  0x2a   : > { %v527_v1 = vsel %vm525_vm0, %v391_v0, 0  ;;  %v3293_v2 = vld [vmem:[%s3840_s15] sm:$0xff]  ;;  %v3298_v7 = vld [vmem:[%s3840_s15 + $0x28] sm:$0xff]  ;;  %v3299_v11 = vld [vmem:[%s3840_s15 + $0x30] sm:$0xff]  ;;  %vm650_vm2 = vcmask 27648  }
  0x2b   : > { %v3297_v3 = vld [vmem:[%s3840_s15 + $0x20] sm:$0xff]  ;;  %536 = vmatpush.bf16.msra.mxu0 %v527_v1  ;;  %3378 = vmatpush.bf16.msra.mxu1 %v527_v1  ;;  %v3306_v8 = vld [vmem:[%s3840_s15 + $0x68] sm:$0xff]  ;;  %v3307_v12 = vld [vmem:[%s3840_s15 + $0x70] sm:$0xff] }
  0x2c   : > { %v3301_v4 = vld [vmem:[%s3840_s15 + $0x40] sm:$0xff]  ;;  %3379 = vmatpush.bf16.msra.mxu2 %v527_v1  ;;  %3380 = vmatpush.bf16.msra.mxu3 %v527_v1  ;;  %v3302_v9 = vld [vmem:[%s3840_s15 + $0x48] sm:$0xff]  ;;  %v3303_v13 = vld [vmem:[%s3840_s15 + $0x50] sm:$0xff] }
  0x2d   : > { %v3305_v5 = vld [vmem:[%s3840_s15 + $0x60] sm:$0xff]  ;;  %v3296_v14 = vld [vmem:[%s3840_s15 + $0x18] sm:$0xff] }
  0x2e   : > { %2970 = vmatmul.msk.bf16.vlgmr.msra.gmra.mxu0 %vm476_vm1, %v3293_v2  ;;  %2974 = vmatmul.msk.bf16.vlgmr.msra.gmra.mxu1 %vm476_vm1, %v3297_v3  ;;  %v3300_v15 = vld [vmem:[%s3840_s15 + $0x38] sm:$0xff]  ;;  %v3889_v18 = vld [vmem:[%s4915_s4] ss:$0 sm:$0xff] }
  0x2f   : > { %2978 = vmatmul.msk.bf16.vlgmr.msra.gmra.mxu2 %vm476_vm1, %v3301_v4  ;;  %2982 = vmatmul.msk.bf16.vlgmr.msra.gmra.mxu3 %vm476_vm1, %v3305_v5  ;;  %v3308_v16 = vld [vmem:[%s3840_s15 + $0x78] sm:$0xff] }
  0x30   : > { %v3304_v17 = vld [vmem:[%s3840_s15 + $0x58] sm:$0xff] }
  0x3e   : > { %2971 = vmatmul.msk.bf16.gmra.mxu0 %vm476_vm1, %v3294_v6  ;;  %2975 = vmatmul.msk.bf16.gmra.mxu1 %vm476_vm1, %v3298_v7 }
  0x3f   : > { %2983 = vmatmul.msk.bf16.gmra.mxu3 %vm476_vm1, %v3306_v8  ;;  %2979 = vmatmul.msk.bf16.gmra.mxu2 %vm476_vm1, %v3302_v9 }
  0x4e   : > { %2972 = vmatmul.msk.bf16.gmra.mxu0 %vm476_vm1, %v3295_v10  ;;  %2976 = vmatmul.msk.bf16.gmra.mxu1 %vm476_vm1, %v3299_v11 }
  0x4f   : > { %2984 = vmatmul.msk.bf16.gmra.mxu3 %vm476_vm1, %v3307_v12  ;;  %2980 = vmatmul.msk.bf16.gmra.mxu2 %vm476_vm1, %v3303_v13 }
  0x5e   : > { %2973 = vmatmul.msk.bf16.gmra.mxu0 %vm476_vm1, %v3296_v14  ;;  %2977 = vmatmul.msk.bf16.gmra.mxu1 %vm476_vm1, %v3300_v15 }
  0x5f   : > { %2985 = vmatmul.msk.bf16.gmra.mxu3 %vm476_vm1, %v3308_v16  ;;  %2981 = vmatmul.msk.bf16.gmra.mxu2 %vm476_vm1, %v3304_v17 }
  0xab   : > { %v538_v19 = vpop.f32.mrf.mxu0  ;;  %v558_v20 = vpop.f32.mrf.mxu1 }
  0xac   : > { %v539_v21 = vadd.f32 %v3889_v18, %v538_v19  ;;  %v559_v22 = vadd.f32 %v3889_v18, %v558_v20 }
  0xae   : > { %v618_v23 = vpack.c.bf16 %v539_v21, %v539_v21  ;;  %v626_v24 = vpack.c.bf16 %v559_v22, %v559_v22 }
  0xb0   : > { %651 = vst.msk [vmem:[#allocation2] sm:$0xf] %vm650_vm2, %v618_v23  ;;  %859 = vrot.lane.b32.xlu1 %v626_v24, %s3692_s13  ;;  %731 = vrot.lane.b32.xlu2 %v626_v24, %s3693_s17 }
  0xb1   : > { %659 = vst.msk [vmem:[#allocation2 + $0x20] sm:$0xf] %vm650_vm2, %v626_v24  ;;  %715 = vrot.lane.b32.xlu0 %v618_v23, %s3693_s17 }
  0xb2   : > { %v578_v25 = vpop.f32.mrf.mxu2  ;;  %v598_v26 = vpop.f32.mrf.mxu3 }
  0xb3   : > { %v540_v27 = vpop.f32.mrf.mxu0  ;;  %v560_v28 = vpop.f32.mrf.mxu1  ;;  %v579_v29 = vadd.f32 %v3889_v18, %v578_v25  ;;  %v599_v30 = vadd.f32 %v3889_v18, %v598_v26 }
  0xb4   : > { %v541_v31 = vadd.f32 %v3889_v18, %v540_v27  ;;  %v561_v32 = vadd.f32 %v3889_v18, %v560_v28 }
  0xb5   : > { %v3902_v33 = vpack.c.bf16 %v579_v29, %v579_v29  ;;  %v3906_v36 = vpack.c.bf16 %v599_v30, %v599_v30 }
  0xb6   : > { %v3904_v34 = vpack.c.bf16 %v541_v31, %v541_v31  ;;  %v627_v35 = vpack.c.bf16 %v561_v32, %v561_v32 }
  0xb7   : > { %667 = vst.msk [vmem:[#allocation2 + $0x40] sm:$0xf] %vm650_vm2, %v3902_v33 }
  0xb8   : > { %652 = vst.msk [vmem:[#allocation2 + $0x4] sm:$0xf] %vm650_vm2, %v3904_v34  ;;  %972 = vrot.lane.b32.xlu1 %v618_v23, %s3694_s19  ;;  %843 = vrot.lane.b32.xlu2 %v618_v23, %s3692_s13 }
  0xb9   : > { %660 = vst.msk [vmem:[#allocation2 + $0x24] sm:$0xf] %vm650_vm2, %v627_v35  ;;  %988 = vrot.lane.b32.xlu0 %v626_v24, %s3694_s19 }
  0xba   : > { %675 = vst.msk [vmem:[#allocation2 + $0x60] sm:$0xf] %vm650_vm2, %v3906_v36  ;;  %v580_v37 = vpop.f32.mrf.mxu2  ;;  %v600_v38 = vpop.f32.mrf.mxu3 }
  0xbb   : > { %v581_v39 = vadd.f32 %v3889_v18, %v580_v37  ;;  %v601_v40 = vadd.f32 %v3889_v18, %v600_v38  ;;  %v543_v41 = vpop.f32.mrf.mxu0  ;;  %v563_v42 = vpop.f32.mrf.mxu1 }
  0xbc   : > { %v544_v43 = vadd.f32 %v3889_v18, %v543_v41  ;;  %v564_v44 = vadd.f32 %v3889_v18, %v563_v42 }
  0xbd   : > { %v3922_v45 = vpack.c.bf16 %v581_v39, %v581_v39  ;;  %v3924_v46 = vpack.c.bf16 %v601_v40, %v601_v40 }
  0xbe   : > { %v3926_v47 = vpack.c.bf16 %v544_v43, %v544_v43  ;;  %v628_v48 = vpack.c.bf16 %v564_v44, %v564_v44 }
  0xbf   : > { %668 = vst.msk [vmem:[#allocation2 + $0x44] sm:$0xf] %vm650_vm2, %v3922_v45 }
  0xc0   : > { %676 = vst.msk [vmem:[#allocation2 + $0x64] sm:$0xf] %vm650_vm2, %v3924_v46  ;;  %747 = vrot.lane.b32.xlu1 %v3902_v33, %s3693_s17  ;;  %891 = vrot.lane.b32.xlu2 %v3906_v36, %s3692_s13 }
  0xc1   : > { %763 = vrot.lane.b32.xlu0 %v3906_v36, %s3693_s17  ;;  %653 = vst.msk [vmem:[#allocation2 + $0x8] sm:$0xf] %vm650_vm2, %v3926_v47 }
  0xc2   : > { %661 = vst.msk [vmem:[#allocation2 + $0x28] sm:$0xf] %vm650_vm2, %v628_v48  ;;  %v603_v49 = vpop.f32.mrf.mxu3  ;;  %v583_v58 = vpop.f32.mrf.mxu2 }
  0xc3   : > { %v545_v50 = vpop.f32.mrf.mxu0  ;;  %v565_v51 = vpop.f32.mrf.mxu1  ;;  %v604_v52 = vadd.f32 %v3889_v18, %v603_v49  ;;  %v584_v59 = vadd.f32 %v3889_v18, %v583_v58 }
  0xc4   : > { %v546_v53 = vadd.f32 %v3889_v18, %v545_v50  ;;  %v566_v54 = vadd.f32 %v3889_v18, %v565_v51 }
  0xc5   : > { %v3944_v55 = vpack.c.bf16 %v604_v52, %v604_v52  ;;  %v3961_v60 = vpack.c.bf16 %v584_v59, %v584_v59 }
  0xc6   : > { %v3946_v56 = vpack.c.bf16 %v546_v53, %v546_v53  ;;  %v3948_v57 = vpack.c.bf16 %v566_v54, %v566_v54 }
  0xc7   : > { %677 = vst.msk [vmem:[#allocation2 + $0x68] sm:$0xf] %vm650_vm2, %v3944_v55 }
  0xc8   : > { %990 = vrot.lane.b32.xlu1 %v627_v35, %s3694_s19  ;;  %861 = vrot.lane.b32.xlu2 %v627_v35, %s3692_s13  ;;  %654 = vst.msk [vmem:[#allocation2 + $0xc] sm:$0xf] %vm650_vm2, %v3946_v56 }
  0xc9   : > { %875 = vrot.lane.b32.xlu0 %v3902_v33, %s3692_s13  ;;  %662 = vst.msk [vmem:[#allocation2 + $0x2c] sm:$0xf] %vm650_vm2, %v3948_v57 }
  0xca   : > { %669 = vst.msk [vmem:[#allocation2 + $0x48] sm:$0xf] %vm650_vm2, %v3961_v60  ;;  %v605_v61 = vpop.f32.mrf.mxu3  ;;  %v585_v0 = vpop.f32.mrf.mxu2 }
  0xcb   : > { %v606_v62 = vadd.f32 %v3889_v18, %v605_v61  ;;  %v586_v1 = vadd.f32 %v3889_v18, %v585_v0  ;;  %v548_v3 = vpop.f32.mrf.mxu0  ;;  %v568_v4 = vpop.f32.mrf.mxu1 }
  0xcc   : > { %v549_v5 = vadd.f32 %v3889_v18, %v548_v3  ;;  %v569_v6 = vadd.f32 %v3889_v18, %v568_v4 }
  0xcd   : > { %v3972_v63 = vpack.c.bf16 %v606_v62, %v606_v62  ;;  %v3982_v2 = vpack.c.bf16 %v586_v1, %v586_v1 }
  0xce   : > { %v622_v7 = vpack.c.bf16 %v549_v5, %v549_v5  ;;  %v3998_v8 = vpack.c.bf16 %v569_v6, %v569_v6 }
  0xcf   : > { %678 = vst.msk [vmem:[#allocation2 + $0x6c] sm:$0xf] %vm650_vm2, %v3972_v63 }
  0xd0   : > { %765 = vrot.lane.b32.xlu1 %v3924_v46, %s3693_s17  ;;  %974 = vrot.lane.b32.xlu2 %v3904_v34, %s3694_s19  ;;  %670 = vst.msk [vmem:[#allocation2 + $0x4c] sm:$0xf] %vm650_vm2, %v3982_v2 }
  0xd1   : > { %717 = vrot.lane.b32.xlu0 %v3904_v34, %s3693_s17  ;;  %655 = vst.msk [vmem:[#allocation2 + $0x10] sm:$0xf] %vm650_vm2, %v622_v7 }
  0xd2   : > { %663 = vst.msk [vmem:[#allocation2 + $0x30] sm:$0xf] %vm650_vm2, %v3998_v8  ;;  %v608_v10 = vpop.f32.mrf.mxu3  ;;  %v588_v16 = vpop.f32.mrf.mxu2 }
  0xd3   : > { %v570_v9 = vpop.f32.mrf.mxu1  ;;  %v609_v12 = vadd.f32 %v3889_v18, %v608_v10  ;;  %v550_v15 = vpop.f32.mrf.mxu0  ;;  %v589_v19 = vadd.f32 %v3889_v18, %v588_v16 }
  0xd4   : > { %v571_v11 = vadd.f32 %v3889_v18, %v570_v9  ;;  %v551_v17 = vadd.f32 %v3889_v18, %v550_v15 }
  0xd5   : > { %v4012_v14 = vpack.c.bf16 %v609_v12, %v609_v12  ;;  %v4029_v23 = vpack.c.bf16 %v589_v19, %v589_v19 }
  0xd6   : > { %v4010_v13 = vpack.c.bf16 %v571_v11, %v571_v11  ;;  %v4027_v22 = vpack.c.bf16 %v551_v17, %v551_v17 }
  0xd7   : > { %679 = vst.msk [vmem:[#allocation2 + $0x70] sm:$0xf] %vm650_vm2, %v4012_v14 }
  0xd8   : > { %877 = vrot.lane.b32.xlu1 %v3922_v45, %s3692_s13  ;;  %749 = vrot.lane.b32.xlu2 %v3922_v45, %s3693_s17  ;;  %664 = vst.msk [vmem:[#allocation2 + $0x34] sm:$0xf] %vm650_vm2, %v4010_v13 }
  0xd9   : > { %733 = vrot.lane.b32.xlu0 %v627_v35, %s3693_s17  ;;  %656 = vst.msk [vmem:[#allocation2 + $0x14] sm:$0xf] %vm650_vm2, %v4027_v22 }
  0xda   : > { %v610_v20 = vpop.f32.mrf.mxu3  ;;  %671 = vst.msk [vmem:[#allocation2 + $0x50] sm:$0xf] %vm650_vm2, %v4029_v23  ;;  %v590_v25 = vpop.f32.mrf.mxu2 }
  0xdb   : > { %v611_v21 = vadd.f32 %v3889_v18, %v610_v20  ;;  %v591_v26 = vadd.f32 %v3889_v18, %v590_v25  ;;  %v553_v31 = vpop.f32.mrf.mxu0  ;;  %v573_v32 = vpop.f32.mrf.mxu1 }
  0xdc   : > { %v574_v35 = vadd.f32 %v3889_v18, %v573_v32 }
  0xdd   : > { %v4031_v24 = vpack.c.bf16 %v611_v21, %v611_v21  ;;  %v4050_v27 = vpack.c.bf16 %v591_v26, %v591_v26 }
  0xde   : > { %v4080_v40 = vpack.c.bf16 %v574_v35, %v574_v35 }
  0xdf   : > { %680 = vst.msk [vmem:[#allocation2 + $0x74] sm:$0xf] %vm650_vm2, %v4031_v24 }
  0xe0   : > { %719 = vrot.lane.b32.xlu1 %v3926_v47, %s3693_s17  ;;  %992 = vrot.lane.b32.xlu2 %v628_v48, %s3694_s19  ;;  %672 = vst.msk [vmem:[#allocation2 + $0x54] sm:$0xf] %vm650_vm2, %v4050_v27 }
  0xe1   : > { %845 = vrot.lane.b32.xlu0 %v3904_v34, %s3692_s13  ;;  %v554_v34 = vadd.f32 %v3889_v18, %v553_v31  ;;  %665 = vst.msk [vmem:[#allocation2 + $0x38] sm:$0xf] %vm650_vm2, %v4080_v40 }
  0xe2   : > { %v593_v58 = vpop.f32.mrf.mxu2 }
  0xe3   : > { %v4075_v37 = vpack.c.bf16 %v554_v34, %v554_v34  ;;  %v555_v42 = vpop.f32.mrf.mxu0  ;;  %v575_v43 = vpop.f32.mrf.mxu1  ;;  %v594_v59 = vadd.f32 %v3889_v18, %v593_v58 }
  0xe4   : > { %v556_v44 = vadd.f32 %v3889_v18, %v555_v42 }
  0xe5   : > { %657 = vst.msk [vmem:[#allocation2 + $0x18] sm:$0xf] %vm650_vm2, %v4075_v37  ;;  %v4117_v0 = vpack.c.bf16 %v594_v59, %v594_v59 }
  0xe6   : > { %v4094_v50 = vpack.c.bf16 %v556_v44, %v556_v44 }
  0xe7   : > { %673 = vst.msk [vmem:[#allocation2 + $0x58] sm:$0xf] %vm650_vm2, %v4117_v0 }
  0xe8   : > { %735 = vrot.lane.b32.xlu1 %v628_v48, %s3693_s17  ;;  %767 = vrot.lane.b32.xlu2 %v3944_v55, %s3693_s17  ;;  %658 = vst.msk [vmem:[#allocation2 + $0x1c] sm:$0xf] %vm650_vm2, %v4094_v50 }
  0xe9   : > { %893 = vrot.lane.b32.xlu0 %v3924_v46, %s3692_s13 }
  0xea   : > { %v595_v6 = vpop.f32.mrf.mxu2 }
  0xf0   : > { %847 = vrot.lane.b32.xlu1 %v3926_v47, %s3692_s13  ;;  %879 = vrot.lane.b32.xlu2 %v3961_v60, %s3692_s13 }
  0xf1   : > { %863 = vrot.lane.b32.xlu0 %v628_v48, %s3692_s13  ;;  %v613_v48 = vpop.f32.mrf.mxu3 }
  0xf2   : > { %v614_v49 = vadd.f32 %v3889_v18, %v613_v48 }
  0xf8   : > { %895 = vrot.lane.b32.xlu1 %v3944_v55, %s3692_s13  ;;  %737 = vrot.lane.b32.xlu2 %v3948_v57, %s3693_s17 }
  0xf9   : > { %976 = vrot.lane.b32.xlu0 %v3926_v47, %s3694_s19  ;;  %v576_v47 = vadd.f32 %v3889_v18, %v575_v43  ;;  %v615_v61 = vpop.f32.mrf.mxu3 }
  0xfa   : > { %v616_v62 = vadd.f32 %v3889_v18, %v615_v61 }
  0xfb   : > { %v4100_v53 = vpack.c.bf16 %v576_v47, %v576_v47 }
  0xfc   : > { %v4123_v4 = vpack.c.bf16 %v616_v62, %v616_v62 }
  0xfd   : > { %666 = vst.msk [vmem:[#allocation2 + $0x3c] sm:$0xf] %vm650_vm2, %v4100_v53 }
  0xfe   : > { %682 = vst.msk [vmem:[#allocation2 + $0x7c] sm:$0xf] %vm650_vm2, %v4123_v4 }
 0x100   : > { %721 = vrot.lane.b32.xlu1 %v3946_v56, %s3693_s17  ;;  %849 = vrot.lane.b32.xlu2 %v3946_v56, %s3692_s13 }
 0x101   : > { %751 = vrot.lane.b32.xlu0 %v3961_v60, %s3693_s17 }
 0x108   : > { %865 = vrot.lane.b32.xlu1 %v3948_v57, %s3692_s13  ;;  %897 = vrot.lane.b32.xlu2 %v3972_v63, %s3692_s13 }
 0x109   : > { %769 = vrot.lane.b32.xlu0 %v3972_v63, %s3693_s17 }
 0x10a   : > { %v732_v28 = vpop.permute.xlu2 %731 }
 0x10b   : > { %819 = vst.msk [vmem:[#allocation3 + $0x20] sm:$0xf] %vm650_vm2, %v732_v28 }
 0x110   : > { %978 = vrot.lane.b32.xlu1 %v3946_v56, %s3694_s19  ;;  %723 = vrot.lane.b32.xlu2 %v622_v7, %s3693_s17  ;;  %v4103_v56 = vpack.c.bf16 %v614_v49, %v614_v49 }
 0x111   : > { %881 = vrot.lane.b32.xlu0 %v3982_v2, %s3692_s13 }
 0x112   : > { %v844_v29 = vpop.permute.xlu2 %843  ;;  %681 = vst.msk [vmem:[#allocation2 + $0x78] sm:$0xf] %vm650_vm2, %v4103_v56 }
 0x113   : > { %940 = vst.msk [vmem:[#allocation2 + $0x80] sm:$0xf] %vm650_vm2, %v844_v29 }
 0x118   : > { %753 = vrot.lane.b32.xlu1 %v3982_v2, %s3693_s17  ;;  %867 = vrot.lane.b32.xlu2 %v3998_v8, %s3692_s13 }
 0x119   : > { %739 = vrot.lane.b32.xlu0 %v3998_v8, %s3693_s17 }
 0x11a   : > { %v892_v30 = vpop.permute.xlu2 %891 }
 0x11b   : > { %964 = vst.msk [vmem:[#allocation2 + $0xe0] sm:$0xf] %vm650_vm2, %v892_v30 }
 0x120   : > { %771 = vrot.lane.b32.xlu1 %v4012_v14, %s3693_s17  ;;  %980 = vrot.lane.b32.xlu2 %v622_v7, %s3694_s19 }
 0x121   : > { %851 = vrot.lane.b32.xlu0 %v622_v7, %s3692_s13  ;;  %v596_v7 = vadd.f32 %v3889_v18, %v595_v6 }
 0x122   : > { %v860_v38 = vpop.permute.xlu1 %859  ;;  %v862_v39 = vpop.permute.xlu2 %861 }
 0x123   : > { %948 = vst.msk [vmem:[#allocation2 + $0xa0] sm:$0xf] %vm650_vm2, %v860_v38  ;;  %v716_v41 = vpop.permute.xlu0 %715  ;;  %v4135_v9 = vpack.c.bf16 %v596_v7, %v596_v7 }
 0x124   : > { %949 = vst.msk [vmem:[#allocation2 + $0xa4] sm:$0xf] %vm650_vm2, %v862_v39 }
 0x125   : > { %811 = vst.msk [vmem:[#allocation3] sm:$0xf] %vm650_vm2, %v716_v41 }
 0x126   : > { %674 = vst.msk [vmem:[#allocation2 + $0x5c] sm:$0xf] %vm650_vm2, %v4135_v9 }
 0x128   : > { %883 = vrot.lane.b32.xlu1 %v4029_v23, %s3692_s13  ;;  %755 = vrot.lane.b32.xlu2 %v4029_v23, %s3693_s17 }
 0x129   : > { %899 = vrot.lane.b32.xlu0 %v4012_v14, %s3692_s13 }
 0x12a   : > { %v973_v51 = vpop.permute.xlu1 %972  ;;  %v975_v52 = vpop.permute.xlu2 %974 }
 0x12b   : > { %1069 = vst.msk [vmem:[#allocation3 + $0x80] sm:$0xf] %vm650_vm2, %v973_v51  ;;  %v989_v54 = vpop.permute.xlu0 %988 }
 0x12c   : > { %1070 = vst.msk [vmem:[#allocation3 + $0x84] sm:$0xf] %vm650_vm2, %v975_v52 }
 0x12d   : > { %1077 = vst.msk [vmem:[#allocation3 + $0xa0] sm:$0xf] %vm650_vm2, %v989_v54 }
 0x130   : > { %741 = vrot.lane.b32.xlu1 %v4010_v13, %s3693_s17  ;;  %725 = vrot.lane.b32.xlu2 %v4027_v22, %s3693_s17 }
 0x131   : > { %869 = vrot.lane.b32.xlu0 %v4010_v13, %s3692_s13 }
 0x132   : > { %v748_v1 = vpop.permute.xlu1 %747  ;;  %v750_v3 = vpop.permute.xlu2 %749 }
 0x133   : > { %827 = vst.msk [vmem:[#allocation3 + $0x40] sm:$0xf] %vm650_vm2, %v748_v1  ;;  %v764_v5 = vpop.permute.xlu0 %763 }
 0x134   : > { %828 = vst.msk [vmem:[#allocation3 + $0x44] sm:$0xf] %vm650_vm2, %v750_v3 }
 0x135   : > { %835 = vst.msk [vmem:[#allocation3 + $0x60] sm:$0xf] %vm650_vm2, %v764_v5 }
 0x138   : > { %853 = vrot.lane.b32.xlu1 %v4027_v22, %s3692_s13  ;;  %773 = vrot.lane.b32.xlu2 %v4031_v24, %s3693_s17 }
 0x139   : > { %982 = vrot.lane.b32.xlu0 %v4027_v22, %s3694_s19 }
 0x13a   : > { %v991_v10 = vpop.permute.xlu1 %990  ;;  %v993_v11 = vpop.permute.xlu2 %992 }
 0x13b   : > { %1078 = vst.msk [vmem:[#allocation3 + $0xa4] sm:$0xf] %vm650_vm2, %v991_v10  ;;  %v876_v12 = vpop.permute.xlu0 %875 }
 0x13c   : > { %1079 = vst.msk [vmem:[#allocation3 + $0xa8] sm:$0xf] %vm650_vm2, %v993_v11 }
 0x13d   : > { %956 = vst.msk [vmem:[#allocation2 + $0xc0] sm:$0xf] %vm650_vm2, %v876_v12 }
 0x140   : > { %901 = vrot.lane.b32.xlu1 %v4031_v24, %s3692_s13  ;;  %885 = vrot.lane.b32.xlu2 %v4050_v27, %s3692_s13 }
 0x141   : > { %757 = vrot.lane.b32.xlu0 %v4050_v27, %s3693_s17 }
 0x142   : > { %v766_v18 = vpop.permute.xlu1 %765  ;;  %v768_v15 = vpop.permute.xlu2 %767 }
 0x143   : > { %836 = vst.msk [vmem:[#allocation3 + $0x64] sm:$0xf] %vm650_vm2, %v766_v18  ;;  %v718_v16 = vpop.permute.xlu0 %717 }
 0x144   : > { %837 = vst.msk [vmem:[#allocation3 + $0x68] sm:$0xf] %vm650_vm2, %v768_v15 }
 0x145   : > { %812 = vst.msk [vmem:[#allocation3 + $0x4] sm:$0xf] %vm650_vm2, %v718_v16 }
 0x148   : > { %871 = vrot.lane.b32.xlu1 %v4080_v40, %s3692_s13  ;;  %743 = vrot.lane.b32.xlu2 %v4080_v40, %s3693_s17 }
 0x149   : > { %727 = vrot.lane.b32.xlu0 %v4075_v37, %s3693_s17 }
 0x14a   : > { %v878_v17 = vpop.permute.xlu1 %877  ;;  %v880_v19 = vpop.permute.xlu2 %879 }
 0x14b   : > { %957 = vst.msk [vmem:[#allocation2 + $0xc4] sm:$0xf] %vm650_vm2, %v878_v17  ;;  %v734_v20 = vpop.permute.xlu0 %733 }
 0x14c   : > { %958 = vst.msk [vmem:[#allocation2 + $0xc8] sm:$0xf] %vm650_vm2, %v880_v19 }
 0x14d   : > { %820 = vst.msk [vmem:[#allocation3 + $0x24] sm:$0xf] %vm650_vm2, %v734_v20 }
 0x150   : > { %984 = vrot.lane.b32.xlu1 %v4075_v37, %s3694_s19  ;;  %855 = vrot.lane.b32.xlu2 %v4075_v37, %s3692_s13 }
 0x151   : > { %775 = vrot.lane.b32.xlu0 %v4103_v56, %s3693_s17 }
 0x152   : > { %v720_v21 = vpop.permute.xlu1 %719  ;;  %v738_v22 = vpop.permute.xlu2 %737 }
 0x153   : > { %813 = vst.msk [vmem:[#allocation3 + $0x8] sm:$0xf] %vm650_vm2, %v720_v21  ;;  %v846_v25 = vpop.permute.xlu0 %845 }
 0x154   : > { %822 = vst.msk [vmem:[#allocation3 + $0x2c] sm:$0xf] %vm650_vm2, %v738_v22 }
 0x155   : > { %941 = vst.msk [vmem:[#allocation2 + $0x84] sm:$0xf] %vm650_vm2, %v846_v25 }
 0x158   : > { %759 = vrot.lane.b32.xlu1 %v4117_v0, %s3693_s17  ;;  %903 = vrot.lane.b32.xlu2 %v4103_v56, %s3692_s13 }
 0x159   : > { %887 = vrot.lane.b32.xlu0 %v4117_v0, %s3692_s13 }
 0x15a   : > { %v736_v26 = vpop.permute.xlu1 %735  ;;  %v850_v28 = vpop.permute.xlu2 %849 }
 0x15b   : > { %821 = vst.msk [vmem:[#allocation3 + $0x28] sm:$0xf] %vm650_vm2, %v736_v26  ;;  %v894_v29 = vpop.permute.xlu0 %893 }
 0x15c   : > { %943 = vst.msk [vmem:[#allocation2 + $0x8c] sm:$0xf] %vm650_vm2, %v850_v28 }
 0x15d   : > { %965 = vst.msk [vmem:[#allocation2 + $0xe4] sm:$0xf] %vm650_vm2, %v894_v29 }
 0x160   : > { %729 = vrot.lane.b32.xlu1 %v4094_v50, %s3693_s17  ;;  %873 = vrot.lane.b32.xlu2 %v4100_v53, %s3692_s13 }
 0x161   : > { %745 = vrot.lane.b32.xlu0 %v4100_v53, %s3693_s17 }
 0x162   : > { %v848_v30 = vpop.permute.xlu1 %847  ;;  %v898_v31 = vpop.permute.xlu2 %897 }
 0x163   : > { %942 = vst.msk [vmem:[#allocation2 + $0x88] sm:$0xf] %vm650_vm2, %v848_v30  ;;  %v864_v32 = vpop.permute.xlu0 %863 }
 0x164   : > { %967 = vst.msk [vmem:[#allocation2 + $0xec] sm:$0xf] %vm650_vm2, %v898_v31 }
 0x165   : > { %950 = vst.msk [vmem:[#allocation2 + $0xa8] sm:$0xf] %vm650_vm2, %v864_v32 }
 0x168   : > { %777 = vrot.lane.b32.xlu1 %v4123_v4, %s3693_s17  ;;  %986 = vrot.lane.b32.xlu2 %v4094_v50, %s3694_s19 }
 0x169   : > { %857 = vrot.lane.b32.xlu0 %v4094_v50, %s3692_s13 }
 0x16a   : > { %v896_v34 = vpop.permute.xlu1 %895  ;;  %v724_v35 = vpop.permute.xlu2 %723 }
 0x16b   : > { %966 = vst.msk [vmem:[#allocation2 + $0xe8] sm:$0xf] %vm650_vm2, %v896_v34  ;;  %v977_v37 = vpop.permute.xlu0 %976 }
 0x16c   : > { %815 = vst.msk [vmem:[#allocation3 + $0x10] sm:$0xf] %vm650_vm2, %v724_v35 }
 0x16d   : > { %1071 = vst.msk [vmem:[#allocation3 + $0x88] sm:$0xf] %vm650_vm2, %v977_v37 }
 0x170   : > { %889 = vrot.lane.b32.xlu1 %v4135_v9, %s3692_s13  ;;  %761 = vrot.lane.b32.xlu2 %v4135_v9, %s3693_s17 }
 0x171   : > { %905 = vrot.lane.b32.xlu0 %v4123_v4, %s3692_s13 }
 0x172   : > { %v722_v38 = vpop.permute.xlu1 %721  ;;  %v868_v39 = vpop.permute.xlu2 %867 }
 0x173   : > { %814 = vst.msk [vmem:[#allocation3 + $0xc] sm:$0xf] %vm650_vm2, %v722_v38  ;;  %v752_v41 = vpop.permute.xlu0 %751 }
 0x174   : > { %952 = vst.msk [vmem:[#allocation2 + $0xb0] sm:$0xf] %vm650_vm2, %v868_v39 }
 0x175   : > { %829 = vst.msk [vmem:[#allocation3 + $0x48] sm:$0xf] %vm650_vm2, %v752_v41 }
 0x178   : > { %996 = vrot.lane.b32.xlu1 %v3998_v8, %s3694_s19  ;;  %998 = vrot.lane.b32.xlu2 %v4010_v13, %s3694_s19 }
 0x179   : > { %994 = vrot.lane.b32.xlu0 %v3948_v57, %s3694_s19 }
 0x17a   : > { %v866_v42 = vpop.permute.xlu1 %865  ;;  %v981_v43 = vpop.permute.xlu2 %980 }
 0x17b   : > { %951 = vst.msk [vmem:[#allocation2 + $0xac] sm:$0xf] %vm650_vm2, %v866_v42  ;;  %v770_v44 = vpop.permute.xlu0 %769 }
 0x17c   : > { %1073 = vst.msk [vmem:[#allocation3 + $0x90] sm:$0xf] %vm650_vm2, %v981_v43 }
 0x17d   : > { %838 = vst.msk [vmem:[#allocation3 + $0x6c] sm:$0xf] %vm650_vm2, %v770_v44 }
 0x180   : > { %1002 = vrot.lane.b32.xlu1 %v4100_v53, %s3694_s19  ;;  %1004 = vrot.lane.b32.xlu2 %v3902_v33, %s3694_s19 }
 0x181   : > { %1000 = vrot.lane.b32.xlu0 %v4080_v40, %s3694_s19 }
 0x182   : > { %v979_v8 = vpop.permute.xlu1 %978  ;;  %v756_v57 = vpop.permute.xlu2 %755 }
 0x183   : > { %1072 = vst.msk [vmem:[#allocation3 + $0x8c] sm:$0xf] %vm650_vm2, %v979_v8  ;;  %v882_v13 = vpop.permute.xlu0 %881 }
 0x184   : > { %831 = vst.msk [vmem:[#allocation3 + $0x50] sm:$0xf] %vm650_vm2, %v756_v57 }
 0x185   : > { %959 = vst.msk [vmem:[#allocation2 + $0xcc] sm:$0xf] %vm650_vm2, %v882_v13 }
 0x188   : > { %1008 = vrot.lane.b32.xlu1 %v3961_v60, %s3694_s19  ;;  %1010 = vrot.lane.b32.xlu2 %v3982_v2, %s3694_s19 }
 0x189   : > { %1006 = vrot.lane.b32.xlu0 %v3922_v45, %s3694_s19 }
 0x18a   : > { %v754_v33 = vpop.permute.xlu1 %753  ;;  %v726_v40 = vpop.permute.xlu2 %725 }
 0x18b   : > { %830 = vst.msk [vmem:[#allocation3 + $0x4c] sm:$0xf] %vm650_vm2, %v754_v33  ;;  %v740_v47 = vpop.permute.xlu0 %739 }
 0x18c   : > { %816 = vst.msk [vmem:[#allocation3 + $0x14] sm:$0xf] %vm650_vm2, %v726_v40 }
 0x18d   : > { %823 = vst.msk [vmem:[#allocation3 + $0x30] sm:$0xf] %vm650_vm2, %v740_v47 }
 0x190   : > { %1014 = vrot.lane.b32.xlu1 %v4050_v27, %s3694_s19  ;;  %1016 = vrot.lane.b32.xlu2 %v4117_v0, %s3694_s19 }
 0x191   : > { %1012 = vrot.lane.b32.xlu0 %v4029_v23, %s3694_s19 }
 0x192   : > { %v772_v60 = vpop.permute.xlu1 %771  ;;  %v774_v45 = vpop.permute.xlu2 %773 }
 0x193   : > { %839 = vst.msk [vmem:[#allocation3 + $0x70] sm:$0xf] %vm650_vm2, %v772_v60  ;;  %v852_v2 = vpop.permute.xlu0 %851 }
 0x194   : > { %840 = vst.msk [vmem:[#allocation3 + $0x74] sm:$0xf] %vm650_vm2, %v774_v45 }
 0x195   : > { %944 = vst.msk [vmem:[#allocation2 + $0x90] sm:$0xf] %vm650_vm2, %v852_v2 }
 0x198   : > { %1020 = vrot.lane.b32.xlu1 %v3906_v36, %s3694_s19  ;;  %1022 = vrot.lane.b32.xlu2 %v3924_v46, %s3694_s19 }
 0x199   : > { %1018 = vrot.lane.b32.xlu0 %v4135_v9, %s3694_s19 }
 0x19a   : > { %v884_v27 = vpop.permute.xlu1 %883  ;;  %v886_v23 = vpop.permute.xlu2 %885 }
 0x19b   : > { %960 = vst.msk [vmem:[#allocation2 + $0xd0] sm:$0xf] %vm650_vm2, %v884_v27  ;;  %v900_v48 = vpop.permute.xlu0 %899 }
 0x19c   : > { %961 = vst.msk [vmem:[#allocation2 + $0xd4] sm:$0xf] %vm650_vm2, %v886_v23 }
 0x19d   : > { %968 = vst.msk [vmem:[#allocation2 + $0xf0] sm:$0xf] %vm650_vm2, %v900_v48 }
 0x1a0   : > { %1026 = vrot.lane.b32.xlu1 %v3972_v63, %s3694_s19  ;;  %1028 = vrot.lane.b32.xlu2 %v4012_v14, %s3694_s19 }
 0x1a1   : > { %1024 = vrot.lane.b32.xlu0 %v3944_v55, %s3694_s19 }
 0x1a2   : > { %v742_v36 = vpop.permute.xlu1 %741  ;;  %v744_v46 = vpop.permute.xlu2 %743 }
 0x1a3   : > { %824 = vst.msk [vmem:[#allocation3 + $0x34] sm:$0xf] %vm650_vm2, %v742_v36  ;;  %v870_v49 = vpop.permute.xlu0 %869 }
 0x1a4   : > { %825 = vst.msk [vmem:[#allocation3 + $0x38] sm:$0xf] %vm650_vm2, %v744_v46 }
 0x1a5   : > { %953 = vst.msk [vmem:[#allocation2 + $0xb4] sm:$0xf] %vm650_vm2, %v870_v49 }
 0x1a8   : > { %1032 = vrot.lane.b32.xlu1 %v4103_v56, %s3694_s19  ;;  %1034 = vrot.lane.b32.xlu2 %v4123_v4, %s3694_s19 }
 0x1a9   : > { %1030 = vrot.lane.b32.xlu0 %v4031_v24, %s3694_s19 }
 0x1aa   : > { %v854_v63 = vpop.permute.xlu1 %853  ;;  %v856_v55 = vpop.permute.xlu2 %855 }
 0x1ab   : > { %945 = vst.msk [vmem:[#allocation2 + $0x94] sm:$0xf] %vm650_vm2, %v854_v63  ;;  %v983_v14 = vpop.permute.xlu0 %982 }
 0x1ac   : > { %946 = vst.msk [vmem:[#allocation2 + $0x98] sm:$0xf] %vm650_vm2, %v856_v55 }
 0x1ad   : > { %1074 = vst.msk [vmem:[#allocation3 + $0x94] sm:$0xf] %vm650_vm2, %v983_v14 }
 0x1b2   : > { %v902_v50 = vpop.permute.xlu1 %901  ;;  %v904_v51 = vpop.permute.xlu2 %903 }
 0x1b3   : > { %969 = vst.msk [vmem:[#allocation2 + $0xf4] sm:$0xf] %vm650_vm2, %v902_v50  ;;  %v758_v52 = vpop.permute.xlu0 %757 }
 0x1b4   : > { %970 = vst.msk [vmem:[#allocation2 + $0xf8] sm:$0xf] %vm650_vm2, %v904_v51 }
 0x1b5   : > { %832 = vst.msk [vmem:[#allocation3 + $0x54] sm:$0xf] %vm650_vm2, %v758_v52 }
 0x1ba   : > { %v872_v53 = vpop.permute.xlu1 %871  ;;  %v874_v24 = vpop.permute.xlu2 %873 }
 0x1bb   : > { %954 = vst.msk [vmem:[#allocation2 + $0xb8] sm:$0xf] %vm650_vm2, %v872_v53  ;;  %v728_v54 = vpop.permute.xlu0 %727 }
 0x1bc   : > { %955 = vst.msk [vmem:[#allocation2 + $0xbc] sm:$0xf] %vm650_vm2, %v874_v24 }
 0x1bd   : > { %817 = vst.msk [vmem:[#allocation3 + $0x18] sm:$0xf] %vm650_vm2, %v728_v54 }
 0x1c2   : > { %v985_v56 = vpop.permute.xlu1 %984  ;;  %v987_v58 = vpop.permute.xlu2 %986 }
 0x1c3   : > { %1075 = vst.msk [vmem:[#allocation3 + $0x98] sm:$0xf] %vm650_vm2, %v985_v56  ;;  %v776_v59 = vpop.permute.xlu0 %775 }
 0x1c4   : > { %1076 = vst.msk [vmem:[#allocation3 + $0x9c] sm:$0xf] %vm650_vm2, %v987_v58 }
 0x1c5   : > { %841 = vst.msk [vmem:[#allocation3 + $0x78] sm:$0xf] %vm650_vm2, %v776_v59 }
 0x1ca   : > { %v760_v61 = vpop.permute.xlu1 %759  ;;  %v762_v62 = vpop.permute.xlu2 %761 }
 0x1cb   : > { %833 = vst.msk [vmem:[#allocation3 + $0x58] sm:$0xf] %vm650_vm2, %v760_v61  ;;  %v888_v0 = vpop.permute.xlu0 %887 }
 0x1cc   : > { %834 = vst.msk [vmem:[#allocation3 + $0x5c] sm:$0xf] %vm650_vm2, %v762_v62 }
 0x1cd   : > { %962 = vst.msk [vmem:[#allocation2 + $0xd8] sm:$0xf] %vm650_vm2, %v888_v0 }
 0x1d2   : > { %v730_v1 = vpop.permute.xlu1 %729  ;;  %v999_v3 = vpop.permute.xlu2 %998 }
 0x1d3   : > { %818 = vst.msk [vmem:[#allocation3 + $0x1c] sm:$0xf] %vm650_vm2, %v730_v1  ;;  %v746_v4 = vpop.permute.xlu0 %745 }
 0x1d4   : > { %1082 = vst.msk [vmem:[#allocation3 + $0xb4] sm:$0xf] %vm650_vm2, %v999_v3 }
 0x1d5   : > { %826 = vst.msk [vmem:[#allocation3 + $0x3c] sm:$0xf] %vm650_vm2, %v746_v4 }
 0x1da   : > { %v778_v5 = vpop.permute.xlu1 %777  ;;  %v1005_v6 = vpop.permute.xlu2 %1004 }
 0x1db   : > { %842 = vst.msk [vmem:[#allocation3 + $0x7c] sm:$0xf] %vm650_vm2, %v778_v5  ;;  %v858_v7 = vpop.permute.xlu0 %857 }
 0x1dc   : > { %1085 = vst.msk [vmem:[#allocation3 + $0xc0] sm:$0xf] %vm650_vm2, %v1005_v6 }
 0x1dd   : > { %947 = vst.msk [vmem:[#allocation2 + $0x9c] sm:$0xf] %vm650_vm2, %v858_v7 }
 0x1e2   : > { %v890_v9 = vpop.permute.xlu1 %889  ;;  %v1011_v10 = vpop.permute.xlu2 %1010 }
 0x1e3   : > { %963 = vst.msk [vmem:[#allocation2 + $0xdc] sm:$0xf] %vm650_vm2, %v890_v9  ;;  %v906_v11 = vpop.permute.xlu0 %905 }
 0x1e4   : > { %1088 = vst.msk [vmem:[#allocation3 + $0xcc] sm:$0xf] %vm650_vm2, %v1011_v10 }
 0x1e5   : > { %971 = vst.msk [vmem:[#allocation2 + $0xfc] sm:$0xf] %vm650_vm2, %v906_v11 }
 0x1ea   : > { %v997_v12 = vpop.permute.xlu1 %996  ;;  %v1017_v18 = vpop.permute.xlu2 %1016 }
 0x1eb   : > { %1081 = vst.msk [vmem:[#allocation3 + $0xb0] sm:$0xf] %vm650_vm2, %v997_v12  ;;  %v995_v15 = vpop.permute.xlu0 %994 }
 0x1ec   : > { %1091 = vst.msk [vmem:[#allocation3 + $0xd8] sm:$0xf] %vm650_vm2, %v1017_v18 }
 0x1ed   : > { %1080 = vst.msk [vmem:[#allocation3 + $0xac] sm:$0xf] %vm650_vm2, %v995_v15 }
 0x1f2   : > { %v1003_v16 = vpop.permute.xlu1 %1002  ;;  %v1023_v17 = vpop.permute.xlu2 %1022 }
 0x1f3   : > { %1084 = vst.msk [vmem:[#allocation3 + $0xbc] sm:$0xf] %vm650_vm2, %v1003_v16  ;;  %v1001_v19 = vpop.permute.xlu0 %1000 }
 0x1f4   : > { %1094 = vst.msk [vmem:[#allocation3 + $0xe4] sm:$0xf] %vm650_vm2, %v1023_v17 }
 0x1f5   : > { %1083 = vst.msk [vmem:[#allocation3 + $0xb8] sm:$0xf] %vm650_vm2, %v1001_v19 }
 0x1fa   : > { %v1009_v20 = vpop.permute.xlu1 %1008  ;;  %v1029_v21 = vpop.permute.xlu2 %1028 }
 0x1fb   : > { %1087 = vst.msk [vmem:[#allocation3 + $0xc8] sm:$0xf] %vm650_vm2, %v1009_v20  ;;  %v1007_v22 = vpop.permute.xlu0 %1006 }
 0x1fc   : > { %1097 = vst.msk [vmem:[#allocation3 + $0xf0] sm:$0xf] %vm650_vm2, %v1029_v21 }
 0x1fd   : > { %1086 = vst.msk [vmem:[#allocation3 + $0xc4] sm:$0xf] %vm650_vm2, %v1007_v22 }
 0x202   : > { %v1015_v25 = vpop.permute.xlu1 %1014  ;;  %v1035_v26 = vpop.permute.xlu2 %1034 }
 0x203   : > { %1090 = vst.msk [vmem:[#allocation3 + $0xd4] sm:$0xf] %vm650_vm2, %v1015_v25  ;;  %v1013_v28 = vpop.permute.xlu0 %1012 }
 0x204   : > { %1100 = vst.msk [vmem:[#allocation3 + $0xfc] sm:$0xf] %vm650_vm2, %v1035_v26 }
 0x205   : > { %1089 = vst.msk [vmem:[#allocation3 + $0xd0] sm:$0xf] %vm650_vm2, %v1013_v28 }
 0x20a   : > { %v1021_v29 = vpop.permute.xlu1 %1020 }
 0x20b   : > { %1093 = vst.msk [vmem:[#allocation3 + $0xe0] sm:$0xf] %vm650_vm2, %v1021_v29  ;;  %v1019_v30 = vpop.permute.xlu0 %1018 }
 0x20c   : > { %1092 = vst.msk [vmem:[#allocation3 + $0xdc] sm:$0xf] %vm650_vm2, %v1019_v30 }
 0x212   : > { %v1027_v31 = vpop.permute.xlu1 %1026 }
 0x213   : > { %1096 = vst.msk [vmem:[#allocation3 + $0xec] sm:$0xf] %vm650_vm2, %v1027_v31  ;;  %v1025_v32 = vpop.permute.xlu0 %1024 }
 0x214   : > { %1095 = vst.msk [vmem:[#allocation3 + $0xe8] sm:$0xf] %vm650_vm2, %v1025_v32 }
 0x21a   : > { %v1033_v34 = vpop.permute.xlu1 %1032 }
 0x21b   : > { %1099 = vst.msk [vmem:[#allocation3 + $0xf8] sm:$0xf] %vm650_vm2, %v1033_v34  ;;  %v1031_v35 = vpop.permute.xlu0 %1030 }
 0x21c   : > { %1098 = vst.msk [vmem:[#allocation3 + $0xf4] sm:$0xf] %vm650_vm2, %v1031_v35 }
 0x21d PF: > { %p2986_p4 = scmp.ne.s32.totalorder %s3666_s30, 0 }
 0x21e   : > { %s2987_s23 = sshll.u32 (!%p2986_p4), %s3670_s9, 7  ;;  %s3695_s11 = smov (!%p2986_p4), 124  }
 0x21f   : > { %1103 = sbr.rel (%p2986_p4) target bundleno = 847 (0x34f), region = 56  ;;  %s1105_s24 = sshra.s32 (!%p2986_p4), %s2987_s23, 3 }
 0x220   : > { %s2988_s25 = sshll.u32 (!%p2986_p4), %s1105_s24, 2 }
 0x221   : > { %s1108_s26 = scalar_lea.vmem (!%p2986_p4), %s3840_s15, %s2988_s25 }
 0x224   : > { %v1125_v37 = vld [vmem:[%s4912_s1] sm:$0xf]  ;;  %vm1195_vm3 = vcmask 1043456   ;;  %vm1170_vm4 = vcmask 64512   ;;  %v3311_v41 = vld [vmem:[%s1108_s26 + $0x10] sm:$0xff]  ;;  %v3310_v44 = vld [vmem:[%s1108_s26 + $0x8] sm:$0xff] }
 0x225   : > { %v1197_v38 = vsel %vm1195_vm3, %v1125_v37, 0  ;;  %v3309_v39 = vld [vmem:[%s1108_s26] sm:$0xff]  ;;  %v3315_v43 = vld [vmem:[%s1108_s26 + $0x30] sm:$0xff]  ;;  %v3312_v8 = vld [vmem:[%s1108_s26 + $0x18] sm:$0xff]  ;;  %vm1264_vm5 = vcmask 27648  }
 0x226   : > { %1206 = vmatpush.bf16.msra.mxu0 %v1197_v38  ;;  %3381 = vmatpush.bf16.msra.mxu1 %v1197_v38  ;;  %v3313_v42 = vld [vmem:[%s1108_s26 + $0x20] sm:$0xff]  ;;  %v3314_v57 = vld [vmem:[%s1108_s26 + $0x28] sm:$0xff]  ;;  %v3316_v13 = vld [vmem:[%s1108_s26 + $0x38] sm:$0xff] }
 0x227   : > { %3382 = vmatpush.bf16.msra.mxu2 %v1197_v38  ;;  %3383 = vmatpush.bf16.msra.mxu3 %v1197_v38  ;;  %v4326_v33 = vld [vmem:[%s4913_s2] ss:$0 sm:$0xff] }
 0x229   : > { %3021 = vmatmul.msk.bf16.vlgmr.msra.gmra.mxu0 %vm1170_vm4, %v3309_v39  ;;  %3023 = vmatmul.msk.bf16.vlgmr.msra.gmra.mxu1 %vm1170_vm4, %v3311_v41 }
 0x22a   : > { %3025 = vmatmul.msk.bf16.vlgmr.msra.gmra.mxu2 %vm1170_vm4, %v3313_v42  ;;  %3027 = vmatmul.msk.bf16.vlgmr.msra.gmra.mxu3 %vm1170_vm4, %v3315_v43 }
 0x239   : > { %3022 = vmatmul.msk.bf16.gmra.mxu0 %vm1170_vm4, %v3310_v44  ;;  %3024 = vmatmul.msk.bf16.gmra.mxu1 %vm1170_vm4, %v3312_v8 }
 0x23a   : > { %3026 = vmatmul.msk.bf16.gmra.mxu2 %vm1170_vm4, %v3314_v57  ;;  %3028 = vmatmul.msk.bf16.gmra.mxu3 %vm1170_vm4, %v3316_v13 }
 0x2a6   : > { %v1208_v40 = vpop.f32.mrf.mxu0  ;;  %v1218_v47 = vpop.f32.mrf.mxu1 }
 0x2a7   : > { %v1209_v60 = vadd.f32 %v4326_v33, %v1208_v40  ;;  %v1219_v45 = vadd.f32 %v4326_v33, %v1218_v47 }
 0x2a9   : > { %v1248_v2 = vpack.c.bf16 %v1209_v60, %v1209_v60  ;;  %v1252_v27 = vpack.c.bf16 %v1219_v45, %v1219_v45 }
 0x2ab   : > { %1265 = vst.msk [vmem:[#allocation4] sm:$0xf] %vm1264_vm5, %v1248_v2  ;;  %1305 = vrot.lane.b32.xlu2 %v1252_v27, %s3695_s11  ;;  %1297 = vrot.lane.b32.xlu0 %v1248_v2, %s3695_s11 }
 0x2ac   : > { %1269 = vst.msk [vmem:[#allocation4 + $0x10] sm:$0xf] %vm1264_vm5, %v1252_v27 }
 0x2ad   : > { %v1228_v23 = vpop.f32.mrf.mxu2  ;;  %v1238_v48 = vpop.f32.mrf.mxu3 }
 0x2ae   : > { %v1229_v36 = vadd.f32 %v4326_v33, %v1228_v23  ;;  %v1210_v46 = vpop.f32.mrf.mxu0  ;;  %v1239_v49 = vadd.f32 %v4326_v33, %v1238_v48  ;;  %v1220_v63 = vpop.f32.mrf.mxu1 }
 0x2af   : > { %v1211_v55 = vadd.f32 %v4326_v33, %v1210_v46  ;;  %v1221_v14 = vadd.f32 %v4326_v33, %v1220_v63 }
 0x2b0   : > { %v1256_v50 = vpack.c.bf16 %v1229_v36, %v1229_v36  ;;  %v1260_v51 = vpack.c.bf16 %v1239_v49, %v1239_v49 }
 0x2b1   : > { %v1249_v52 = vpack.c.bf16 %v1211_v55, %v1211_v55  ;;  %v1253_v53 = vpack.c.bf16 %v1221_v14, %v1221_v14 }
 0x2b2   : > { %1273 = vst.msk [vmem:[#allocation4 + $0x20] sm:$0xf] %vm1264_vm5, %v1256_v50 }
 0x2b3   : > { %1266 = vst.msk [vmem:[#allocation4 + $0x4] sm:$0xf] %vm1264_vm5, %v1249_v52  ;;  %1313 = vrot.lane.b32.xlu2 %v1256_v50, %s3695_s11  ;;  %1321 = vrot.lane.b32.xlu0 %v1260_v51, %s3695_s11 }
 0x2b4   : > { %1277 = vst.msk [vmem:[#allocation4 + $0x30] sm:$0xf] %vm1264_vm5, %v1260_v51 }
 0x2b5   : > { %v1230_v24 = vpop.f32.mrf.mxu2  ;;  %1270 = vst.msk [vmem:[#allocation4 + $0x14] sm:$0xf] %vm1264_vm5, %v1253_v53  ;;  %v1240_v54 = vpop.f32.mrf.mxu3 }
 0x2b6   : > { %v1231_v56 = vadd.f32 %v4326_v33, %v1230_v24  ;;  %v1213_v58 = vpop.f32.mrf.mxu0  ;;  %v1241_v59 = vadd.f32 %v4326_v33, %v1240_v54  ;;  %v1223_v61 = vpop.f32.mrf.mxu1 }
 0x2b7   : > { %v1214_v62 = vadd.f32 %v4326_v33, %v1213_v58  ;;  %v1224_v0 = vadd.f32 %v4326_v33, %v1223_v61 }
 0x2b8   : > { %v1257_v1 = vpack.c.bf16 %v1231_v56, %v1231_v56  ;;  %v1261_v3 = vpack.c.bf16 %v1241_v59, %v1241_v59 }
 0x2b9   : > { %v1250_v4 = vpack.c.bf16 %v1214_v62, %v1214_v62  ;;  %v1254_v5 = vpack.c.bf16 %v1224_v0, %v1224_v0 }
 0x2ba   : > { %1274 = vst.msk [vmem:[#allocation4 + $0x24] sm:$0xf] %vm1264_vm5, %v1257_v1 }
 0x2bb   : > { %1267 = vst.msk [vmem:[#allocation4 + $0x8] sm:$0xf] %vm1264_vm5, %v1250_v4  ;;  %1307 = vrot.lane.b32.xlu2 %v1253_v53, %s3695_s11  ;;  %1301 = vrot.lane.b32.xlu1 %v1250_v4, %s3695_s11 }
 0x2bc   : > { %1278 = vst.msk [vmem:[#allocation4 + $0x34] sm:$0xf] %vm1264_vm5, %v1261_v3  ;;  %1299 = vrot.lane.b32.xlu0 %v1249_v52, %s3695_s11 }
 0x2bd   : > { %v1233_v6 = vpop.f32.mrf.mxu2  ;;  %1271 = vst.msk [vmem:[#allocation4 + $0x18] sm:$0xf] %vm1264_vm5, %v1254_v5  ;;  %v1243_v7 = vpop.f32.mrf.mxu3 }
 0x2be   : > { %v1234_v9 = vadd.f32 %v4326_v33, %v1233_v6  ;;  %v1215_v10 = vpop.f32.mrf.mxu0  ;;  %v1225_v11 = vpop.f32.mrf.mxu1  ;;  %v1244_v12 = vadd.f32 %v4326_v33, %v1243_v7 }
 0x2bf   : > { %v1216_v18 = vadd.f32 %v4326_v33, %v1215_v10  ;;  %v1226_v15 = vadd.f32 %v4326_v33, %v1225_v11 }
 0x2c0   : > { %v1258_v16 = vpack.c.bf16 %v1234_v9, %v1234_v9  ;;  %v1262_v20 = vpack.c.bf16 %v1244_v12, %v1244_v12 }
 0x2c1   : > { %v1251_v17 = vpack.c.bf16 %v1216_v18, %v1216_v18  ;;  %v1255_v19 = vpack.c.bf16 %v1226_v15, %v1226_v15 }
 0x2c2   : > { %1275 = vst.msk [vmem:[#allocation4 + $0x28] sm:$0xf] %vm1264_vm5, %v1258_v16 }
 0x2c3   : > { %1268 = vst.msk [vmem:[#allocation4 + $0xc] sm:$0xf] %vm1264_vm5, %v1251_v17  ;;  %1317 = vrot.lane.b32.xlu1 %v1258_v16, %s3695_s11 }
 0x2c4   : > { %1315 = vrot.lane.b32.xlu0 %v1257_v1, %s3695_s11  ;;  %1272 = vst.msk [vmem:[#allocation4 + $0x1c] sm:$0xf] %vm1264_vm5, %v1255_v19 }
 0x2c5   : > { %v1235_v21 = vpop.f32.mrf.mxu2  ;;  %1279 = vst.msk [vmem:[#allocation4 + $0x38] sm:$0xf] %vm1264_vm5, %v1262_v20  ;;  %v1245_v22 = vpop.f32.mrf.mxu3 }
 0x2c6   : > { %v1236_v25 = vadd.f32 %v4326_v33, %v1235_v21  ;;  %v1246_v26 = vadd.f32 %v4326_v33, %v1245_v22 }
 0x2c8   : > { %v1259_v28 = vpack.c.bf16 %v1236_v25, %v1236_v25  ;;  %v1263_v29 = vpack.c.bf16 %v1246_v26, %v1246_v26 }
 0x2ca   : > { %1276 = vst.msk [vmem:[#allocation4 + $0x2c] sm:$0xf] %vm1264_vm5, %v1259_v28  ;;  %1319 = vrot.lane.b32.xlu2 %v1259_v28, %s3695_s11 }
 0x2cb   : > { %1303 = vrot.lane.b32.xlu1 %v1251_v17, %s3695_s11  ;;  %1280 = vst.msk [vmem:[#allocation4 + $0x3c] sm:$0xf] %vm1264_vm5, %v1263_v29 }
 0x2cc   : > { %1309 = vrot.lane.b32.xlu0 %v1254_v5, %s3695_s11 }
 0x2d2   : > { %1325 = vrot.lane.b32.xlu2 %v1262_v20, %s3695_s11 }
 0x2d3   : > { %1311 = vrot.lane.b32.xlu1 %v1255_v19, %s3695_s11 }
 0x2d4   : > { %1327 = vrot.lane.b32.xlu0 %v1263_v29, %s3695_s11 }
 0x2db   : > { %1323 = vrot.lane.b32.xlu1 %v1261_v3, %s3695_s11 }
 0x305   : > { %v1306_v30 = vpop.permute.xlu2 %1305 }
 0x306   : > { %1350 = vst.msk [vmem:[#allocation4 + $0x50] sm:$0xf] %vm1264_vm5, %v1306_v30 }
 0x30d   : > { %v1314_v31 = vpop.permute.xlu2 %1313 }
 0x30e   : > { %1354 = vst.msk [vmem:[#allocation4 + $0x60] sm:$0xf] %vm1264_vm5, %v1314_v31 }
 0x315   : > { %v1308_v32 = vpop.permute.xlu2 %1307 }
 0x316   : > { %1351 = vst.msk [vmem:[#allocation4 + $0x54] sm:$0xf] %vm1264_vm5, %v1308_v32 }
 0x31d   : > { %v1298_v34 = vpop.permute.xlu0 %1297 }
 0x31e   : > { %1346 = vst.msk [vmem:[#allocation4 + $0x40] sm:$0xf] %vm1264_vm5, %v1298_v34 }
 0x324   : > { %v1320_v35 = vpop.permute.xlu2 %1319 }
 0x325   : > { %1357 = vst.msk [vmem:[#allocation4 + $0x6c] sm:$0xf] %vm1264_vm5, %v1320_v35  ;;  %v1322_v37 = vpop.permute.xlu0 %1321 }
 0x326   : > { %1358 = vst.msk [vmem:[#allocation4 + $0x70] sm:$0xf] %vm1264_vm5, %v1322_v37 }
 0x32c   : > { %v1326_v38 = vpop.permute.xlu2 %1325 }
 0x32d   : > { %1360 = vst.msk [vmem:[#allocation4 + $0x78] sm:$0xf] %vm1264_vm5, %v1326_v38  ;;  %v1302_v39 = vpop.permute.xlu1 %1301 }
 0x32e   : > { %1348 = vst.msk [vmem:[#allocation4 + $0x48] sm:$0xf] %vm1264_vm5, %v1302_v39  ;;  %v1300_v41 = vpop.permute.xlu0 %1299 }
 0x32f   : > { %1347 = vst.msk [vmem:[#allocation4 + $0x44] sm:$0xf] %vm1264_vm5, %v1300_v41 }
 0x335   : > { %v1318_v42 = vpop.permute.xlu1 %1317 }
 0x336   : > { %1356 = vst.msk [vmem:[#allocation4 + $0x68] sm:$0xf] %vm1264_vm5, %v1318_v42  ;;  %v1316_v43 = vpop.permute.xlu0 %1315 }
 0x337   : > { %1355 = vst.msk [vmem:[#allocation4 + $0x64] sm:$0xf] %vm1264_vm5, %v1316_v43 }
 0x33d   : > { %v1304_v44 = vpop.permute.xlu1 %1303 }
 0x33e   : > { %1349 = vst.msk [vmem:[#allocation4 + $0x4c] sm:$0xf] %vm1264_vm5, %v1304_v44  ;;  %v1310_v8 = vpop.permute.xlu0 %1309 }
 0x33f   : > { %1352 = vst.msk [vmem:[#allocation4 + $0x58] sm:$0xf] %vm1264_vm5, %v1310_v8 }
 0x345   : > { %v1312_v57 = vpop.permute.xlu1 %1311 }
 0x346   : > { %1353 = vst.msk [vmem:[#allocation4 + $0x5c] sm:$0xf] %vm1264_vm5, %v1312_v57  ;;  %v1328_v13 = vpop.permute.xlu0 %1327 }
 0x347   : > { %1361 = vst.msk [vmem:[#allocation4 + $0x7c] sm:$0xf] %vm1264_vm5, %v1328_v13 }
 0x34d   : > { %v1324_v33 = vpop.permute.xlu1 %1323 }
 0x34e   : > { %1359 = vst.msk [vmem:[#allocation4 + $0x74] sm:$0xf] %vm1264_vm5, %v1324_v33 }
 0x34f PF: > { %s3326_s12 = sshll.u32 %s3666_s30, 7  ;;  %vm1570_vm6 = vcmask 31744   ;;  %s4430_s17 = sshll.u32 %s3666_s30, 6 }
 0x350   : > { %s4395_s13 = scalar_lea.vmem [#allocation2], %s3326_s12  ;;  %s1364_s19 = scalar_lea.vmem [#allocation4], %s4430_s17 }
 0x351   : > { %v3334_v40 = vld [vmem:[%s4395_s13 + $0x38] sm:$0xff]  ;;  %v3333_v2 = vld [vmem:[%s4395_s13 + $0x30] sm:$0xff]  ;;  %v3332_v36 = vld [vmem:[%s4395_s13 + $0x28] sm:$0xff]  ;;  %s4551_s21 = scalar_lea.vmem [#allocation3], %s3326_s12  ;;  %s4747_s18 = scalar_lea.vmem [#allocation5], %s4430_s17 }
 0x352   : > { %v3342_v47 = vld [vmem:[%s4395_s13 + $0x78] sm:$0xff]  ;;  %v1617_v60 = vsel %vm1570_vm6, %v3334_v40, 0  ;;  %v3341_v27 = vld [vmem:[%s4395_s13 + $0x70] sm:$0xff]  ;;  %v1614_v23 = vsel %vm1570_vm6, %v3333_v2, 0  ;;  %v3340_v46 = vld [vmem:[%s4395_s13 + $0x68] sm:$0xff]  ;;  %v1611_v49 = vsel %vm1570_vm6, %v3332_v36, 0 }
 0x353   : > { %v1641_v45 = vsel %vm1570_vm6, %v3342_v47, 0  ;;  %1643 = vmatpush.bf16.xpose.msra.mxu0 %v1617_v60  ;;  %v1638_v48 = vsel %vm1570_vm6, %v3341_v27, 0  ;;  %v1635_v63 = vsel %vm1570_vm6, %v3340_v46, 0  ;;  %v3331_v55 = vld [vmem:[%s4395_s13 + $0x20] sm:$0xff]  ;;  %v3330_v52 = vld [vmem:[%s4395_s13 + $0x18] sm:$0xff]  ;;  %v3329_v56 = vld [vmem:[%s4395_s13 + $0x10] sm:$0xff] }
 0x354   : > { %1692 = vmatpush.bf16.xpose.msra.mxu1 %v1641_v45  ;;  %v3339_v14 = vld [vmem:[%s4395_s13 + $0x60] sm:$0xff]  ;;  %v1608_v50 = vsel %vm1570_vm6, %v3331_v55, 0  ;;  %v3338_v53 = vld [vmem:[%s4395_s13 + $0x58] sm:$0xff]  ;;  %v1605_v24 = vsel %vm1570_vm6, %v3330_v52, 0  ;;  %v3337_v58 = vld [vmem:[%s4395_s13 + $0x50] sm:$0xff]  ;;  %v1602_v59 = vsel %vm1570_vm6, %v3329_v56, 0 }
 0x355   : > { %v1632_v51 = vsel %vm1570_vm6, %v3339_v14, 0  ;;  %v1629_v54 = vsel %vm1570_vm6, %v3338_v53, 0  ;;  %v1626_v61 = vsel %vm1570_vm6, %v3337_v58, 0  ;;  %v3328_v62 = vld [vmem:[%s4395_s13 + $0x8] sm:$0xff]  ;;  %v3327_v4 = vld [vmem:[%s4395_s13] sm:$0xff]  ;;  %v3320_v11 = vld [vmem:[%s1364_s19 + $0x10] sm:$0xff] }
 0x356   : > { %v3336_v0 = vld [vmem:[%s4395_s13 + $0x48] sm:$0xff]  ;;  %v1599_v1 = vsel %vm1570_vm6, %v3328_v62, 0  ;;  %v3335_v5 = vld [vmem:[%s4395_s13 + $0x40] sm:$0xff]  ;;  %v1596_v6 = vsel %vm1570_vm6, %v3327_v4, 0  ;;  %v3321_v12 = vld [vmem:[%s1364_s19 + $0x18] sm:$0xff]  ;;  %p3211_p6 = scmp.ne.s32.totalorder %s3666_s30, 1 }
 0x357   : > { %v1623_v3 = vsel %vm1570_vm6, %v3336_v0, 0  ;;  %v1620_v7 = vsel %vm1570_vm6, %v3335_v5, 0  ;;  %v3318_v9 = vld [vmem:[%s1364_s19] sm:$0xff]  ;;  %v3319_v10 = vld [vmem:[%s1364_s19 + $0x8] sm:$0xff]  ;;  %v3324_v16 = vld [vmem:[%s1364_s19 + $0x30] sm:$0xff]  ;;  %s3696_s23 = smov (!%p3211_p6), 4  }
 0x358   : > { %v3322_v18 = vld [vmem:[%s1364_s19 + $0x20] sm:$0xff]  ;;  %v3323_v15 = vld [vmem:[%s1364_s19 + $0x28] sm:$0xff]  ;;  %v3325_v26 = vld [vmem:[%s1364_s19 + $0x38] sm:$0xff] }
 0x35b   : > { %1644 = vmatpush.bf16.xpose.msra.mxu0 %v1614_v23 }
 0x35c   : > { %1693 = vmatpush.bf16.xpose.msra.mxu1 %v1638_v48 }
 0x363   : > { %1645 = vmatpush.bf16.xpose.msra.mxu0 %v1611_v49 }
 0x364   : > { %1694 = vmatpush.bf16.xpose.msra.mxu1 %v1635_v63 }
 0x36b   : > { %1646 = vmatpush.bf16.xpose.msra.mxu0 %v1608_v50 }
 0x36c   : > { %1695 = vmatpush.bf16.xpose.msra.mxu1 %v1632_v51 }
 0x373   : > { %1647 = vmatpush.bf16.xpose.msra.mxu0 %v1605_v24 }
 0x374   : > { %1696 = vmatpush.bf16.xpose.msra.mxu1 %v1629_v54 }
 0x37b   : > { %1648 = vmatpush.bf16.xpose.msra.mxu0 %v1602_v59 }
 0x37c   : > { %1697 = vmatpush.bf16.xpose.msra.mxu1 %v1626_v61 }
 0x383   : > { %1649 = vmatpush.bf16.xpose.msra.mxu0 %v1599_v1 }
 0x384   : > { %1698 = vmatpush.bf16.xpose.msra.mxu1 %v1623_v3 }
 0x38b   : > { %1650 = vmatpush.bf16.xpose.msra.mxu0 %v1596_v6 }
 0x38c   : > { %1699 = vmatpush.bf16.xpose.msra.mxu1 %v1620_v7 }
 0x392   : > { %3130 = vmatmul.msk.bf16.vlgmr.msra.gmra.mxu0 %vm1570_vm6, %v3318_v9 }
 0x393   : > { %3138 = vmatmul.msk.bf16.vlgmr.msra.gmra.mxu1 %vm1570_vm6, %v3318_v9 }
 0x3a2   : > { %3131 = vmatmul.msk.bf16.gmra.mxu0 %vm1570_vm6, %v3319_v10 }
 0x3a3   : > { %3139 = vmatmul.msk.bf16.gmra.mxu1 %vm1570_vm6, %v3319_v10 }
 0x3b2   : > { %3132 = vmatmul.msk.bf16.gmra.mxu0 %vm1570_vm6, %v3320_v11 }
 0x3b3   : > { %3140 = vmatmul.msk.bf16.gmra.mxu1 %vm1570_vm6, %v3320_v11 }
 0x3c2   : > { %3133 = vmatmul.msk.bf16.gmra.mxu0 %vm1570_vm6, %v3321_v12 }
 0x3c3   : > { %3141 = vmatmul.msk.bf16.gmra.mxu1 %vm1570_vm6, %v3321_v12 }
 0x3d2   : > { %3134 = vmatmul.msk.bf16.gmra.mxu0 %vm1570_vm6, %v3322_v18 }
 0x3d3   : > { %3142 = vmatmul.msk.bf16.gmra.mxu1 %vm1570_vm6, %v3322_v18 }
 0x3e2   : > { %3135 = vmatmul.msk.bf16.gmra.mxu0 %vm1570_vm6, %v3323_v15 }
 0x3e3   : > { %3143 = vmatmul.msk.bf16.gmra.mxu1 %vm1570_vm6, %v3323_v15 }
 0x3f2   : > { %3136 = vmatmul.msk.bf16.gmra.mxu0 %vm1570_vm6, %v3324_v16 }
 0x3f3   : > { %3144 = vmatmul.msk.bf16.gmra.mxu1 %vm1570_vm6, %v3324_v16 }
 0x402   : > { %3137 = vmatmul.msk.bf16.gmra.mxu0 %vm1570_vm6, %v3325_v26 }
 0x403   : > { %3145 = vmatmul.msk.bf16.gmra.mxu1 %vm1570_vm6, %v3325_v26 }
 0x40f   : > { %v1652_v17 = vpop.f32.mrf.mxu0 }
 0x410   : > { %v1701_v19 = vpop.f32.mrf.mxu1 }
 0x411   : > { %v1741_v20 = vmax.f32 %v1652_v17, %v1701_v19 }
 0x413   : > { %1742 = vmax.xlane.f32.xlu0 %v1741_v20 }
 0x417   : > { %v1654_v21 = vpop.f32.mrf.mxu0 }
 0x418   : > { %v1703_v22 = vpop.f32.mrf.mxu1 }
 0x419   : > { %v1744_v25 = vmax.f32 %v1654_v21, %v1703_v22 }
 0x41b   : > { %1745 = vmax.xlane.f32.xlu0 %v1744_v25 }
 0x41f   : > { %v1657_v28 = vpop.f32.mrf.mxu0 }
 0x420   : > { %v1706_v29 = vpop.f32.mrf.mxu1 }
 0x421   : > { %v1747_v30 = vmax.f32 %v1657_v28, %v1706_v29 }
 0x423   : > { %1748 = vmax.xlane.f32.xlu1 %v1747_v30 }
 0x427   : > { %v4449_v31 = vpop.f32.mrf.mxu0 }
 0x428   : > { %v4451_v32 = vpop.f32.mrf.mxu1 }
 0x429   : > { %v1750_v34 = vmax.f32 %v4449_v31, %v4451_v32 }
 0x42b   : > { %1751 = vmax.xlane.f32.xlu1 %v1750_v34 }
 0x42f   : > { %v4455_v35 = vpop.f32.mrf.mxu0 }
 0x430   : > { %v4457_v37 = vpop.f32.mrf.mxu1 }
 0x431   : > { %v1753_v38 = vmax.f32 %v4455_v35, %v4457_v37 }
 0x433   : > { %1754 = vmax.xlane.f32.xlu2 %v1753_v38 }
 0x437   : > { %v4461_v39 = vpop.f32.mrf.mxu0 }
 0x438   : > { %v4463_v41 = vpop.f32.mrf.mxu1 }
 0x439   : > { %v1756_v42 = vmax.f32 %v4461_v39, %v4463_v41 }
 0x43b   : > { %1757 = vmax.xlane.f32.xlu2 %v1756_v42 }
 0x43f   : > { %v4467_v43 = vpop.f32.mrf.mxu0 }
 0x440   : > { %v4469_v44 = vpop.f32.mrf.mxu1 }
 0x441   : > { %v1759_v8 = vmax.f32 %v4467_v43, %v4469_v44 }
 0x443   : > { %1760 = vmax.xlane.f32.xlu0 %v1759_v8 }
 0x447   : > { %v4473_v57 = vpop.f32.mrf.mxu0 }
 0x448   : > { %v4475_v13 = vpop.f32.mrf.mxu1 }
 0x449   : > { %v1762_v33 = vmax.f32 %v4473_v57, %v4475_v13 }
 0x44b   : > { %1763 = vmax.xlane.f32.xlu1 %v1762_v33 }
 0x44f   : > { %v4479_v40 = vpop.f32.mrf.mxu0 }
 0x450   : > { %v4481_v47 = vpop.f32.mrf.mxu1 }
 0x451   : > { %v1765_v60 = vmax.f32 %v4479_v40, %v4481_v47 }
 0x453   : > { %1766 = vmax.xlane.f32.xlu1 %v1765_v60 }
 0x457   : > { %v4485_v36 = vpop.f32.mrf.mxu0 }
 0x458   : > { %v4487_v46 = vpop.f32.mrf.mxu1 }
 0x459   : > { %v1768_v4 = vmax.f32 %v4485_v36, %v4487_v46 }
 0x45f   : > { %v4495_v24 = vpop.f32.mrf.mxu0 }
 0x460   : > { %v4497_v56 = vpop.f32.mrf.mxu1 }
 0x461   : > { %v1771_v15 = vmax.f32 %v4495_v24, %v4497_v56 }
 0x467   : > { %v4509_v9 = vpop.f32.mrf.mxu0 }
 0x468   : > { %v4511_v10 = vpop.f32.mrf.mxu1 }
 0x470   : > { %v4529_v30 = vpop.f32.mrf.mxu1 }
 0x486   : > { %v1743_v45 = vpop.xlane.xlu0 %1742 }
 0x487   : > { %v1789_v2 = vsub.f32 %v1652_v17, %v1743_v45  ;;  %v1790_v27 = vsub.f32 %v1701_v19, %v1743_v45 }
 0x489   : > { %v1821_v23 = vmul.f32 1.442695, %v1789_v2  ;;  %v1823_v48 = vmul.f32 1.442695, %v1790_v27  ;;  %v4547_v27 = vpop.f32.mrf.mxu1 }
 0x48b   : > { %3483 = vpow2.f32 %v1821_v23 }
 0x48c   : > { %3485 = vpow2.f32 %v1823_v48 }
 0x48e   : > { %v1746_v49 = vpop.xlane.xlu0 %1745 }
 0x48f   : > { %v1791_v63 = vsub.f32 %v1654_v21, %v1746_v49  ;;  %v1792_v55 = vsub.f32 %v1703_v22, %v1746_v49 }
 0x491   : > { %v4489_v14 = vpop.eup %3483  ;;  %v1825_v50 = vmul.f32 1.442695, %v1791_v63  ;;  %v1827_v51 = vmul.f32 1.442695, %v1792_v55 }
 0x492   : > { %v4491_v52 = vpop.eup %3485 }
 0x493   : > { %3487 = vpow2.f32 %v1825_v50  ;;  %v1885_v53 = vadd.f32 %v4491_v52, %v4489_v14 }
 0x494   : > { %3489 = vpow2.f32 %v1827_v51 }
 0x495   : > { %1886 = vadd.xlane.f32.xlu2 %v1885_v53 }
 0x496   : > { %v1749_v54 = vpop.xlane.xlu1 %1748 }
 0x497   : > { %v1793_v58 = vsub.f32 %v1657_v28, %v1749_v54  ;;  %v1794_v59 = vsub.f32 %v1706_v29, %v1749_v54  ;;  %v4525_v28 = vpop.f32.mrf.mxu0 }
 0x498   : > { %v1777_v33 = vmax.f32 %v4525_v28, %v4529_v30 }
 0x499   : > { %v4499_v61 = vpop.eup %3487  ;;  %v1829_v62 = vmul.f32 1.442695, %v1793_v58  ;;  %v1831_v0 = vmul.f32 1.442695, %v1794_v59 }
 0x49a   : > { %v4501_v1 = vpop.eup %3489 }
 0x49b   : > { %3491 = vpow2.f32 %v1829_v62  ;;  %v1888_v3 = vadd.f32 %v4501_v1, %v4499_v61 }
 0x49c   : > { %3493 = vpow2.f32 %v1831_v0 }
 0x49d   : > { %1889 = vadd.xlane.f32.xlu0 %v1888_v3  ;;  %1769 = vmax.xlane.f32.xlu2 %v1768_v4 }
 0x49e   : > { %v1752_v5 = vpop.xlane.xlu1 %1751 }
 0x49f   : > { %v1795_v6 = vsub.f32 %v4449_v31, %v1752_v5  ;;  %v1796_v7 = vsub.f32 %v4451_v32, %v1752_v5  ;;  %v1774_v32 = vmax.f32 %v4509_v9, %v4511_v10  ;;  %v4543_v45 = vpop.f32.mrf.mxu0 }
 0x4a0   : > { %v1780_v54 = vmax.f32 %v4543_v45, %v4547_v27 }
 0x4a1   : > { %v4513_v11 = vpop.eup %3491  ;;  %v1833_v12 = vmul.f32 1.442695, %v1795_v6  ;;  %v1835_v18 = vmul.f32 1.442695, %v1796_v7 }
 0x4a2   : > { %v4517_v16 = vpop.eup %3493 }
 0x4a3   : > { %3495 = vpow2.f32 %v1833_v12  ;;  %v1891_v17 = vadd.f32 %v4517_v16, %v4513_v11 }
 0x4a4   : > { %3497 = vpow2.f32 %v1835_v18 }
 0x4a5   : > { %1892 = vadd.xlane.f32.xlu0 %v1891_v17  ;;  %1772 = vmax.xlane.f32.xlu2 %v1771_v15 }
 0x4a6   : > { %v1755_v19 = vpop.xlane.xlu2 %1754 }
 0x4a7   : > { %v1797_v20 = vsub.f32 %v4455_v35, %v1755_v19  ;;  %v1798_v21 = vsub.f32 %v4457_v37, %v1755_v19  ;;  %v4565_v58 = vpop.f32.mrf.mxu0 }
 0x4a9   : > { %v4523_v22 = vpop.eup %3495  ;;  %v1837_v25 = vmul.f32 1.442695, %v1797_v20  ;;  %v1839_v26 = vmul.f32 1.442695, %v1798_v21 }
 0x4aa   : > { %v4527_v29 = vpop.eup %3497 }
 0x4ab   : > { %3499 = vpow2.f32 %v1837_v25  ;;  %v1894_v31 = vadd.f32 %v4527_v29, %v4523_v22 }
 0x4ac   : > { %3501 = vpow2.f32 %v1839_v26 }
 0x4ad   : > { %1895 = vadd.xlane.f32.xlu1 %v1894_v31  ;;  %1775 = vmax.xlane.f32.xlu0 %v1774_v32  ;;  %v3350_v32 = vld [vmem:[%s4551_s21 + $0x30] sm:$0xff] }
 0x4ae   : > { %v1758_v34 = vpop.xlane.xlu2 %1757 }
 0x4af   : > { %v1799_v35 = vsub.f32 %v4461_v39, %v1758_v34  ;;  %v1800_v37 = vsub.f32 %v4463_v41, %v1758_v34  ;;  %v3351_v39 = vld [vmem:[%s4551_s21 + $0x38] sm:$0xff]  ;;  %v4581_v18 = vpop.f32.mrf.mxu0  ;;  %v3358_v34 = vld [vmem:[%s4551_s21 + $0x70] sm:$0xff] }
 0x4b0   : > { %v3359_v41 = vld [vmem:[%s4551_s21 + $0x78] sm:$0xff]  ;;  %2349 = vmatpush.bf16.msra.mxu2 %v3351_v39  ;;  %v3346_v39 = vld [vmem:[%s4551_s21 + $0x10] sm:$0xff] }
 0x4b1   : > { %v4537_v38 = vpop.eup %3499  ;;  %v1841_v42 = vmul.f32 1.442695, %v1799_v35  ;;  %v1843_v8 = vmul.f32 1.442695, %v1800_v37  ;;  %2398 = vmatpush.bf16.msra.mxu3 %v3359_v41  ;;  %v3349_v35 = vld [vmem:[%s4551_s21 + $0x28] sm:$0xff]  ;;  %v3354_v41 = vld [vmem:[%s4551_s21 + $0x50] sm:$0xff] }
 0x4b2   : > { %v4541_v60 = vpop.eup %3501  ;;  %v3357_v37 = vld [vmem:[%s4551_s21 + $0x68] sm:$0xff] }
 0x4b3   : > { %3503 = vpow2.f32 %v1841_v42  ;;  %v1897_v2 = vadd.f32 %v4541_v60, %v4537_v38  ;;  %v3348_v42 = vld [vmem:[%s4551_s21 + $0x20] sm:$0xff] }
 0x4b4   : > { %3505 = vpow2.f32 %v1843_v8  ;;  %2350 = vmatpush.bf16.msra.mxu2 %v3350_v32  ;;  %v3356_v8 = vld [vmem:[%s4551_s21 + $0x60] sm:$0xff] }
 0x4b5   : > { %1898 = vadd.xlane.f32.xlu1 %v1897_v2  ;;  %1778 = vmax.xlane.f32.xlu0 %v1777_v33  ;;  %v3347_v33 = vld [vmem:[%s4551_s21 + $0x18] sm:$0xff] }
 0x4b6   : > { %v1761_v23 = vpop.xlane.xlu0 %1760  ;;  %2399 = vmatpush.bf16.msra.mxu3 %v3358_v34  ;;  %v3355_v2 = vld [vmem:[%s4551_s21 + $0x58] sm:$0xff] }
 0x4b7   : > { %v1801_v48 = vsub.f32 %v4467_v43, %v1761_v23  ;;  %v1802_v49 = vsub.f32 %v4469_v44, %v1761_v23  ;;  %v4567_v43 = vpop.f32.mrf.mxu1  ;;  %v3345_v23 = vld [vmem:[%s4551_s21 + $0x8] sm:$0xff] }
 0x4b8   : > { %v1783_v5 = vmax.f32 %v4565_v58, %v4567_v43  ;;  %2351 = vmatpush.bf16.msra.mxu2 %v3349_v35 }
 0x4b9   : > { %v4557_v63 = vpop.eup %3503  ;;  %v1845_v55 = vmul.f32 1.442695, %v1801_v48  ;;  %v1847_v50 = vmul.f32 1.442695, %v1802_v49  ;;  %v3353_v48 = vld [vmem:[%s4551_s21 + $0x48] sm:$0xff]  ;;  %v3344_v49 = vld [vmem:[%s4551_s21] sm:$0xff] }
 0x4ba   : > { %v4559_v51 = vpop.eup %3505  ;;  %2400 = vmatpush.bf16.msra.mxu3 %v3357_v37 }
 0x4bb   : > { %3507 = vpow2.f32 %v1845_v55  ;;  %v1900_v53 = vadd.f32 %v4559_v51, %v4557_v63  ;;  %v3352_v55 = vld [vmem:[%s4551_s21 + $0x40] sm:$0xff] }
 0x4bc   : > { %3509 = vpow2.f32 %v1847_v50  ;;  %2352 = vmatpush.bf16.msra.mxu2 %v3348_v42 }
 0x4bd   : > { %1901 = vadd.xlane.f32.xlu2 %v1900_v53  ;;  %1781 = vmax.xlane.f32.xlu1 %v1780_v54 }
 0x4be   : > { %v1764_v44 = vpop.xlane.xlu1 %1763  ;;  %2401 = vmatpush.bf16.msra.mxu3 %v3356_v8 }
 0x4bf   : > { %v1803_v59 = vsub.f32 %v4473_v57, %v1764_v44  ;;  %v1804_v62 = vsub.f32 %v4475_v13, %v1764_v44  ;;  %v4583_v15 = vpop.f32.mrf.mxu1 }
 0x4c0   : > { %v1786_v25 = vmax.f32 %v4581_v18, %v4583_v15  ;;  %2353 = vmatpush.bf16.msra.mxu2 %v3347_v33 }
 0x4c1   : > { %v4571_v0 = vpop.eup %3507  ;;  %v1849_v3 = vmul.f32 1.442695, %v1803_v59  ;;  %v1851_v4 = vmul.f32 1.442695, %v1804_v62 }
 0x4c2   : > { %v4575_v6 = vpop.eup %3509  ;;  %2402 = vmatpush.bf16.msra.mxu3 %v3355_v2 }
 0x4c3   : > { %3511 = vpow2.f32 %v1849_v3  ;;  %v1903_v7 = vadd.f32 %v4575_v6, %v4571_v0 }
 0x4c4   : > { %3513 = vpow2.f32 %v1851_v4  ;;  %2354 = vmatpush.bf16.msra.mxu2 %v3346_v39 }
 0x4c5   : > { %1904 = vadd.xlane.f32.xlu2 %v1903_v7  ;;  %1784 = vmax.xlane.f32.xlu1 %v1783_v5 }
 0x4c6   : > { %v1767_v12 = vpop.xlane.xlu1 %1766  ;;  %2403 = vmatpush.bf16.msra.mxu3 %v3354_v41 }
 0x4c7   : > { %v1805_v57 = vsub.f32 %v4479_v40, %v1767_v12  ;;  %v1806_v13 = vsub.f32 %v4481_v47, %v1767_v12 }
 0x4c8   : > { %2355 = vmatpush.bf16.msra.mxu2 %v3345_v23 }
 0x4c9   : > { %v4585_v17 = vpop.eup %3511  ;;  %v1853_v19 = vmul.f32 1.442695, %v1805_v57  ;;  %v1855_v20 = vmul.f32 1.442695, %v1806_v13 }
 0x4ca   : > { %v4587_v21 = vpop.eup %3513  ;;  %2404 = vmatpush.bf16.msra.mxu3 %v3353_v48 }
 0x4cb   : > { %3515 = vpow2.f32 %v1853_v19  ;;  %v1906_v40 = vadd.f32 %v4587_v21, %v4585_v17 }
 0x4cc   : > { %3517 = vpow2.f32 %v1855_v20  ;;  %2356 = vmatpush.bf16.msra.mxu2 %v3344_v49 }
 0x4cd   : > { %1907 = vadd.xlane.f32.xlu0 %v1906_v40  ;;  %1787 = vmax.xlane.f32.xlu2 %v1786_v25 }
 0x4ce   : > { %2405 = vmatpush.bf16.msra.mxu3 %v3352_v55 }
 0x4d1   : > { %v4593_v47 = vpop.eup %3515 }
 0x4d2   : > { %v4595_v26 = vpop.eup %3517 }
 0x4d3   : > { %v1909_v31 = vadd.f32 %v4595_v26, %v4593_v47 }
 0x4d5   : > { %1910 = vadd.xlane.f32.xlu0 %v1909_v31 }
 0x508   : > { %v1887_v50 = vpop.xlane.xlu2 %1886 }
 0x509   : > { %3519 = vrcp.f32 %v1887_v50  ;;  %v1944_v12 = vand.u32 2147483648, %v1887_v50  ;;  %v1942_v13 = vand.u32 2147483647, %v1887_v50  ;;  %vm1938_vm8 = vweird.f32 %v1887_v50 }
 0x50b   : > { %v1945_v32 = vor.u32 1.1754944e-38, %v1944_v12  ;;  %vm1943_vm10 = vcmp.eq.f32.partialorder %v1942_v13, 8.507059e+37 }
 0x50f   : > { %v3520_v53 = vpop.eup %3519 }
 0x510   : > { %v1934_v54 = vmul.f32 %v3520_v53, %v1887_v50  ;;  %v1890_v44 = vpop.xlane.xlu0 %1889  ;;  %v1770_v59 = vpop.xlane.xlu2 %1769  ;;  %vm1939_vm7 = vweird.f32 %v3520_v53 }
 0x511   : > { %3521 = vrcp.f32 %v1890_v44  ;;  %v1807_v62 = vsub.f32 %v4485_v36, %v1770_v59  ;;  %v1808_v4 = vsub.f32 %v4487_v46, %v1770_v59  ;;  %vm1940_vm9 = vmor %vm1938_vm8, %vm1939_vm7  ;;  %v1959_v23 = vand.u32 2147483648, %v1890_v44 }
 0x512   : > { %v1935_v3 = vsub.f32 1.0, %v1934_v54  ;;  %vm1953_vm12 = vweird.f32 %v1890_v44 }
 0x513   : > { %v1857_v5 = vmul.f32 1.442695, %v1807_v62  ;;  %v1859_v57 = vmul.f32 1.442695, %v1808_v4  ;;  %v1960_v54 = vor.u32 1.1754944e-38, %v1959_v23 }
 0x514   : > { %v1936_v7 = vmul.f32 %v3520_v53, %v1935_v3 }
 0x515   : > { %3523 = vpow2.f32 %v1857_v5 }
 0x516   : > { %3525 = vpow2.f32 %v1859_v57  ;;  %v1937_v19 = vadd.f32 %v3520_v53, %v1936_v7 }
 0x517   : > { %v3522_v20 = vpop.eup %3521 }
 0x518   : > { %v1949_v25 = vmul.f32 %v3522_v20, %v1890_v44  ;;  %v4615_v40 = vpop.xlane.xlu0 %1892  ;;  %v1773_v31 = vpop.xlane.xlu2 %1772  ;;  %v1941_v36 = vsel %vm1940_vm9, %v3520_v53, %v1937_v19  ;;  %vm1954_vm11 = vweird.f32 %v3522_v20 }
 0x519   : > { %3527 = vrcp.f32 %v4615_v40  ;;  %v1809_v46 = vsub.f32 %v4495_v24, %v1773_v31  ;;  %v1810_v35 = vsub.f32 %v4497_v56, %v1773_v31  ;;  %v1946_v37 = vsel %vm1943_vm10, %v1945_v32, %v1941_v36  ;;  %vm1955_vm13 = vmor %vm1953_vm12, %vm1954_vm11 }
 0x51a   : > { %v1950_v34 = vsub.f32 1.0, %v1949_v25  ;;  %v2173_v33 = vmul.f32 %v4489_v14, %v1946_v37  ;;  %v2174_v2 = vmul.f32 %v4491_v52, %v1946_v37  ;;  %v1957_v56 = vand.u32 2147483647, %v1890_v44 }
 0x51b   : > { %v4620_v42 = vpop.eup %3523  ;;  %v1861_v8 = vmul.f32 1.442695, %v1809_v46  ;;  %v1863_v48 = vmul.f32 1.442695, %v1810_v35  ;;  %v1974_v5 = vand.u32 2147483648, %v4615_v40  ;;  %vm1968_vm0 = vweird.f32 %v4615_v40 }
 0x51c   : > { %v4624_v39 = vpop.eup %3525  ;;  %v1951_v41 = vmul.f32 %v3522_v20, %v1950_v34  ;;  %2205 = vst [vmem:[%s3849_s16] sm:$0xff] %v2173_v33  ;;  %vm1958_vm14 = vcmp.eq.f32.partialorder %v1957_v56, 8.507059e+37 }
 0x51d   : > { %3529 = vpow2.f32 %v1861_v8  ;;  %v1912_v24 = vadd.f32 %v4624_v39, %v4620_v42  ;;  %2206 = vst [vmem:[%s3849_s16 + $0x8] sm:$0xff] %v2174_v2  ;;  %v1975_v35 = vor.u32 1.1754944e-38, %v1974_v5 }
 0x51e   : > { %3531 = vpow2.f32 %v1863_v48  ;;  %v1952_v49 = vadd.f32 %v3522_v20, %v1951_v41 }
 0x51f   : > { %v3528_v55 = vpop.eup %3527  ;;  %1913 = vadd.xlane.f32.xlu1 %v1912_v24 }
 0x520   : > { %v1964_v14 = vmul.f32 %v3528_v55, %v4615_v40  ;;  %v4631_v52 = vpop.xlane.xlu1 %1895  ;;  %v1776_v50 = vpop.xlane.xlu0 %1775  ;;  %v1956_v53 = vsel %vm1955_vm13, %v3522_v20, %v1952_v49  ;;  %vm1969_vm15 = vweird.f32 %v3528_v55  ;;  %v1972_v20 = vand.u32 2147483647, %v4615_v40 }
 0x521   : > { %3533 = vrcp.f32 %v4631_v52  ;;  %v1811_v59 = vsub.f32 %v4509_v9, %v1776_v50  ;;  %v1812_v62 = vsub.f32 %v4511_v10, %v1776_v50  ;;  %v1961_v3 = vsel %vm1958_vm14, %v1960_v54, %v1956_v53  ;;  %vm1970_vm1 = vmor %vm1968_vm0, %vm1969_vm15 }
 0x522   : > { %v1965_v44 = vsub.f32 1.0, %v1964_v14  ;;  %v2175_v12 = vmul.f32 %v4499_v61, %v1961_v3  ;;  %v2176_v57 = vmul.f32 %v4501_v1, %v1961_v3  ;;  %vm1973_vm2 = vcmp.eq.f32.partialorder %v1972_v20, 8.507059e+37 }
 0x523   : > { %v4636_v4 = vpop.eup %3529  ;;  %v1865_v7 = vmul.f32 1.442695, %v1811_v59  ;;  %v1867_v9 = vmul.f32 1.442695, %v1812_v62  ;;  %v1989_v49 = vand.u32 2147483648, %v4631_v52  ;;  %vm1983_vm4 = vweird.f32 %v4631_v52 }
 0x524   : > { %v4641_v13 = vpop.eup %3531  ;;  %v1966_v19 = vmul.f32 %v3528_v55, %v1965_v44  ;;  %2207 = vst [vmem:[%s3849_s16 + $0x10] sm:$0xff] %v2175_v12  ;;  %v2237_v10 = vpack.c.bf16 %v2175_v12, %v2173_v33  ;;  %v2238_v25 = vpack.c.bf16 %v2176_v57, %v2174_v2 }
 0x525   : > { %3535 = vpow2.f32 %v1865_v7  ;;  %v1915_v31 = vadd.f32 %v4641_v13, %v4636_v4  ;;  %2208 = vst [vmem:[%s3849_s16 + $0x18] sm:$0xff] %v2176_v57  ;;  %v1990_v59 = vor.u32 1.1754944e-38, %v1989_v49 }
 0x526   : > { %3537 = vpow2.f32 %v1867_v9  ;;  %v1967_v61 = vadd.f32 %v3528_v55, %v1966_v19  ;;  %2357 = vmatmul.bf16.vlgmr.msra.gmra.mxu2 %v2237_v10  ;;  %2406 = vmatmul.bf16.vlgmr.msra.gmra.mxu3 %v2238_v25 }
 0x527   : > { %v3534_v1 = vpop.eup %3533  ;;  %1916 = vadd.xlane.f32.xlu2 %v1915_v31 }
 0x528   : > { %v1979_v36 = vmul.f32 %v3534_v1, %v4631_v52  ;;  %v4650_v32 = vpop.xlane.xlu1 %1898  ;;  %v1779_v46 = vpop.xlane.xlu0 %1778  ;;  %v1971_v34 = vsel %vm1970_vm1, %v3528_v55, %v1967_v61  ;;  %vm1984_vm3 = vweird.f32 %v3534_v1  ;;  %v1987_v55 = vand.u32 2147483647, %v4631_v52 }
 0x529   : > { %3539 = vrcp.f32 %v4650_v32  ;;  %v1813_v37 = vsub.f32 %v4525_v28, %v1779_v46  ;;  %v1814_v8 = vsub.f32 %v4529_v30, %v1779_v46  ;;  %v1976_v33 = vsel %vm1973_vm2, %v1975_v35, %v1971_v34  ;;  %vm1985_vm5 = vmor %vm1983_vm4, %vm1984_vm3 }
 0x52a   : > { %v1980_v40 = vsub.f32 1.0, %v1979_v36  ;;  %v2177_v23 = vmul.f32 %v4513_v11, %v1976_v33  ;;  %v2178_v48 = vmul.f32 %v4517_v16, %v1976_v33  ;;  %vm1988_vm7 = vcmp.eq.f32.partialorder %v1987_v55, 8.507059e+37 }
 0x52b   : > { %v4655_v2 = vpop.eup %3535  ;;  %v1869_v41 = vmul.f32 1.442695, %v1813_v37  ;;  %v1871_v28 = vmul.f32 1.442695, %v1814_v8  ;;  %v2004_v7 = vand.u32 2147483648, %v4650_v32  ;;  %vm1998_vm9 = vweird.f32 %v4650_v32 }
 0x52c   : > { %v4659_v24 = vpop.eup %3537  ;;  %v1981_v56 = vmul.f32 %v3534_v1, %v1980_v40  ;;  %2209 = vst [vmem:[%s3849_s16 + $0x20] sm:$0xff] %v2177_v23  ;;  %v2002_v10 = vand.u32 2147483647, %v4650_v32 }
 0x52d   : > { %3541 = vpow2.f32 %v1869_v41  ;;  %v1918_v30 = vadd.f32 %v4659_v24, %v4655_v2  ;;  %2210 = vst [vmem:[%s3849_s16 + $0x28] sm:$0xff] %v2178_v48  ;;  %v2005_v34 = vor.u32 1.1754944e-38, %v2004_v7 }
 0x52e   : > { %3543 = vpow2.f32 %v1871_v28  ;;  %v1982_v11 = vadd.f32 %v3534_v1, %v1981_v56  ;;  %vm2003_vm11 = vcmp.eq.f32.partialorder %v2002_v10, 8.507059e+37 }
 0x52f   : > { %v3540_v16 = vpop.eup %3539  ;;  %1919 = vadd.xlane.f32.xlu0 %v1918_v30 }
 0x530   : > { %v1994_v14 = vmul.f32 %v3540_v16, %v4650_v32  ;;  %v4669_v50 = vpop.xlane.xlu2 %1901  ;;  %v1782_v53 = vpop.xlane.xlu1 %1781  ;;  %v1986_v54 = vsel %vm1985_vm5, %v3534_v1, %v1982_v11  ;;  %vm1999_vm8 = vweird.f32 %v3540_v16 }
 0x531   : > { %3545 = vrcp.f32 %v4669_v50  ;;  %v1815_v44 = vsub.f32 %v4543_v45, %v1782_v53  ;;  %v1816_v62 = vsub.f32 %v4547_v27, %v1782_v53  ;;  %v1991_v3 = vsel %vm1988_vm7, %v1990_v59, %v1986_v54  ;;  %vm2000_vm10 = vmor %vm1998_vm9, %vm1999_vm8 }
 0x532   : > { %v1995_v52 = vsub.f32 1.0, %v1994_v14  ;;  %v2179_v57 = vmul.f32 %v4523_v22, %v1991_v3  ;;  %v2180_v19 = vmul.f32 %v4527_v29, %v1991_v3  ;;  %v2019_v49 = vand.u32 2147483648, %v4669_v50 }
 0x533   : > { %v4674_v5 = vpop.eup %3541  ;;  %v1873_v12 = vmul.f32 1.442695, %v1815_v44  ;;  %v1875_v45 = vmul.f32 1.442695, %v1816_v62  ;;  %v2017_v28 = vand.u32 2147483647, %v4669_v50  ;;  %vm2013_vm13 = vweird.f32 %v4669_v50 }
 0x534   : > { %v4679_v9 = vpop.eup %3543  ;;  %v1996_v20 = vmul.f32 %v3540_v16, %v1995_v52  ;;  %2211 = vst [vmem:[%s3849_s16 + $0x30] sm:$0xff] %v2179_v57  ;;  %v2239_v27 = vpack.c.bf16 %v2179_v57, %v2177_v23  ;;  %v2240_v25 = vpack.c.bf16 %v2180_v19, %v2178_v48  ;;  %v2020_v14 = vor.u32 1.1754944e-38, %v2019_v49 }
 0x535   : > { %3547 = vpow2.f32 %v1873_v12  ;;  %v1921_v31 = vadd.f32 %v4679_v9, %v4674_v5  ;;  %2212 = vst [vmem:[%s3849_s16 + $0x38] sm:$0xff] %v2180_v19  ;;  %vm2018_vm15 = vcmp.eq.f32.partialorder %v2017_v28, 8.507059e+37 }
 0x536   : > { %3549 = vpow2.f32 %v1875_v45  ;;  %v1997_v22 = vadd.f32 %v3540_v16, %v1996_v20  ;;  %2362 = vmatmul.bf16.gmra.mxu2 %v2239_v27  ;;  %2411 = vmatmul.bf16.gmra.mxu3 %v2240_v25 }
 0x537   : > { %v3546_v29 = vpop.eup %3545  ;;  %1922 = vadd.xlane.f32.xlu1 %v1921_v31 }
 0x538   : > { %v2009_v61 = vmul.f32 %v3546_v29, %v4669_v50  ;;  %v4688_v1 = vpop.xlane.xlu2 %1904  ;;  %v1785_v36 = vpop.xlane.xlu1 %1784  ;;  %v2001_v46 = vsel %vm2000_vm10, %v3540_v16, %v1997_v22  ;;  %vm2014_vm12 = vweird.f32 %v3546_v29 }
 0x539   : > { %3551 = vrcp.f32 %v4688_v1  ;;  %v1817_v35 = vsub.f32 %v4565_v58, %v1785_v36  ;;  %v1818_v37 = vsub.f32 %v4567_v43, %v1785_v36  ;;  %v2006_v40 = vsel %vm2003_vm11, %v2005_v34, %v2001_v46  ;;  %vm2015_vm14 = vmor %vm2013_vm13, %vm2014_vm12 }
 0x53a   : > { %v2010_v32 = vsub.f32 1.0, %v2009_v61  ;;  %v2181_v41 = vmul.f32 %v4537_v38, %v2006_v40  ;;  %v2182_v23 = vmul.f32 %v4541_v60, %v2006_v40  ;;  %v2034_v52 = vand.u32 2147483648, %v4688_v1 }
 0x53b   : > { %v4693_v8 = vpop.eup %3547  ;;  %v1877_v33 = vmul.f32 1.442695, %v1817_v35  ;;  %v1879_v58 = vmul.f32 1.442695, %v1818_v37  ;;  %v2032_v19 = vand.u32 2147483647, %v4688_v1  ;;  %vm2028_vm1 = vweird.f32 %v4688_v1 }
 0x53c   : > { %v4697_v48 = vpop.eup %3549  ;;  %v2011_v56 = vmul.f32 %v3546_v29, %v2010_v32  ;;  %2213 = vst [vmem:[%s3849_s16 + $0x40] sm:$0xff] %v2181_v41  ;;  %v2035_v10 = vor.u32 1.1754944e-38, %v2034_v52 }
 0x53d   : > { %3553 = vpow2.f32 %v1877_v33  ;;  %v1924_v43 = vadd.f32 %v4697_v48, %v4693_v8  ;;  %2214 = vst [vmem:[%s3849_s16 + $0x48] sm:$0xff] %v2182_v23  ;;  %vm2033_vm3 = vcmp.eq.f32.partialorder %v2032_v19, 8.507059e+37 }
 0x53e   : > { %3555 = vpow2.f32 %v1879_v58  ;;  %v2012_v38 = vadd.f32 %v3546_v29, %v2011_v56 }
 0x53f   : > { %v3552_v60 = vpop.eup %3551  ;;  %1925 = vadd.xlane.f32.xlu2 %v1924_v43 }
 0x540   : > { %v2024_v30 = vmul.f32 %v3552_v60, %v4688_v1  ;;  %v1908_v55 = vpop.xlane.xlu0 %1907  ;;  %v1788_v11 = vpop.xlane.xlu2 %1787  ;;  %v2016_v16 = vsel %vm2015_vm14, %v3546_v29, %v2012_v38  ;;  %vm2029_vm0 = vweird.f32 %v3552_v60 }
 0x541   : > { %3557 = vrcp.f32 %v1908_v55  ;;  %v1819_v53 = vsub.f32 %v4581_v18, %v1788_v11  ;;  %v1820_v50 = vsub.f32 %v4583_v15, %v1788_v11  ;;  %v2021_v59 = vsel %vm2018_vm15, %v2020_v14, %v2016_v16  ;;  %vm2030_vm2 = vmor %vm2028_vm1, %vm2029_vm0 }
 0x542   : > { %v2025_v54 = vsub.f32 1.0, %v2024_v30  ;;  %v2183_v3 = vmul.f32 %v4557_v63, %v2021_v59  ;;  %v2184_v7 = vmul.f32 %v4559_v51, %v2021_v59  ;;  %v2049_v46 = vand.u32 2147483648, %v1908_v55 }
 0x543   : > { %v4709_v44 = vpop.eup %3553  ;;  %v1881_v62 = vmul.f32 1.442695, %v1819_v53  ;;  %v1883_v18 = vmul.f32 1.442695, %v1820_v50  ;;  %v2047_v32 = vand.u32 2147483647, %v1908_v55  ;;  %vm2043_vm5 = vweird.f32 %v1908_v55 }
 0x544   : > { %v4714_v12 = vpop.eup %3555  ;;  %v2026_v57 = vmul.f32 %v3552_v60, %v2025_v54  ;;  %2215 = vst [vmem:[%s3849_s16 + $0x50] sm:$0xff] %v2183_v3  ;;  %v2241_v15 = vpack.c.bf16 %v2183_v3, %v2181_v41  ;;  %v2242_v20 = vpack.c.bf16 %v2184_v7, %v2182_v23 }
 0x545   : > { %3559 = vpow2.f32 %v1881_v62  ;;  %v1927_v45 = vadd.f32 %v4714_v12, %v4709_v44  ;;  %2216 = vst [vmem:[%s3849_s16 + $0x58] sm:$0xff] %v2184_v7  ;;  %vm2048_vm8 = vcmp.eq.f32.partialorder %v2047_v32, 8.507059e+37 }
 0x546   : > { %3561 = vpow2.f32 %v1883_v18  ;;  %v2027_v63 = vadd.f32 %v3552_v60, %v2026_v57  ;;  %2367 = vmatmul.bf16.gmra.mxu2 %v2241_v15  ;;  %2416 = vmatmul.bf16.gmra.mxu3 %v2242_v20 }
 0x547   : > { %v3558_v51 = vpop.eup %3557  ;;  %1928 = vadd.xlane.f32.xlu0 %v1927_v45 }
 0x548   : > { %v2039_v27 = vmul.f32 %v3558_v51, %v1908_v55  ;;  %v1911_v25 = vpop.xlane.xlu0 %1910  ;;  %v2031_v31 = vsel %vm2030_vm2, %v3552_v60, %v2027_v63  ;;  %vm2044_vm4 = vweird.f32 %v3558_v51 }
 0x549   : > { %3563 = vrcp.f32 %v1911_v25  ;;  %v2036_v22 = vsel %vm2033_vm3, %v2035_v10, %v2031_v31  ;;  %vm2045_vm7 = vmor %vm2043_vm5, %vm2044_vm4  ;;  %v2064_v43 = vand.u32 2147483648, %v1911_v25  ;;  %v2062_v28 = vand.u32 2147483647, %v1911_v25 }
 0x54a   : > { %v2040_v29 = vsub.f32 1.0, %v2039_v27  ;;  %v2185_v61 = vmul.f32 %v4571_v0, %v2036_v22  ;;  %v2186_v1 = vmul.f32 %v4575_v6, %v2036_v22  ;;  %v2050_v0 = vor.u32 1.1754944e-38, %v2049_v46 }
 0x54b   : > { %v4724_v36 = vpop.eup %3559  ;;  %vm2058_vm10 = vweird.f32 %v1911_v25  ;;  %v2065_v11 = vor.u32 1.1754944e-38, %v2064_v43  ;;  %vm2063_vm12 = vcmp.eq.f32.partialorder %v2062_v28, 8.507059e+37  ;;  %vm2465_vm4 = vcmask 27648  }
 0x54c   : > { %v4726_v34 = vpop.eup %3561  ;;  %v2041_v35 = vmul.f32 %v3558_v51, %v2040_v29  ;;  %2217 = vst [vmem:[%s3849_s16 + $0x60] sm:$0xff] %v2185_v61 }
 0x54d   : > { %v1930_v37 = vadd.f32 %v4726_v34, %v4724_v36  ;;  %2218 = vst [vmem:[%s3849_s16 + $0x68] sm:$0xff] %v2186_v1 }
 0x54e   : > { %v2042_v40 = vadd.f32 %v3558_v51, %v2041_v35 }
 0x54f   : > { %v3564_v33 = vpop.eup %3563  ;;  %1931 = vadd.xlane.f32.xlu1 %v1930_v37 }
 0x550   : > { %v2054_v6 = vmul.f32 %v3564_v33, %v1911_v25  ;;  %v2046_v41 = vsel %vm2045_vm7, %v3558_v51, %v2042_v40  ;;  %vm2059_vm9 = vweird.f32 %v3564_v33 }
 0x551   : > { %v2051_v23 = vsel %vm2048_vm8, %v2050_v0, %v2046_v41  ;;  %vm2060_vm11 = vmor %vm2058_vm10, %vm2059_vm9 }
 0x552   : > { %v2055_v56 = vsub.f32 1.0, %v2054_v6  ;;  %v2187_v49 = vmul.f32 %v4585_v17, %v2051_v23  ;;  %v2188_v58 = vmul.f32 %v4587_v21, %v2051_v23 }
 0x554   : > { %v2056_v38 = vmul.f32 %v3564_v33, %v2055_v56  ;;  %2219 = vst [vmem:[%s3849_s16 + $0x70] sm:$0xff] %v2187_v49  ;;  %v2243_v60 = vpack.c.bf16 %v2187_v49, %v2185_v61  ;;  %v2244_v30 = vpack.c.bf16 %v2188_v58, %v2186_v1 }
 0x555   : > { %2220 = vst [vmem:[%s3849_s16 + $0x78] sm:$0xff] %v2188_v58 }
 0x556   : > { %v2057_v55 = vadd.f32 %v3564_v33, %v2056_v38  ;;  %2372 = vmatmul.bf16.gmra.mxu2 %v2243_v60  ;;  %2421 = vmatmul.bf16.gmra.mxu3 %v2244_v30 }
 0x558   : > { %v2061_v16 = vsel %vm2060_vm11, %v3564_v33, %v2057_v55 }
 0x559   : > { %v2066_v17 = vsel %vm2063_vm12, %v2065_v11, %v2061_v16 }
 0x55a   : > { %v2189_v21 = vmul.f32 %v4593_v47, %v2066_v17  ;;  %v2190_v14 = vmul.f32 %v4595_v26, %v2066_v17 }
 0x55c   : > { %2221 = vst [vmem:[%s3849_s16 + $0x80] sm:$0xff] %v2189_v21 }
 0x55d   : > { %2222 = vst [vmem:[%s3849_s16 + $0x88] sm:$0xff] %v2190_v14 }
 0x592   : > { %v1914_v53 = vpop.xlane.xlu1 %1913 }
 0x593   : > { %3565 = vrcp.f32 %v1914_v53  ;;  %v2079_v3 = vand.u32 2147483648, %v1914_v53  ;;  %v2077_v7 = vand.u32 2147483647, %v1914_v53  ;;  %vm2073_vm14 = vweird.f32 %v1914_v53 }
 0x595   : > { %v2080_v19 = vor.u32 1.1754944e-38, %v2079_v3  ;;  %vm2078_vm0 = vcmp.eq.f32.partialorder %v2077_v7, 8.507059e+37 }
 0x599   : > { %v3566_v54 = vpop.eup %3565 }
 0x59a   : > { %v2069_v50 = vmul.f32 %v3566_v54, %v1914_v53  ;;  %v1917_v59 = vpop.xlane.xlu2 %1916  ;;  %vm2074_vm13 = vweird.f32 %v3566_v54 }
 0x59b   : > { %3567 = vrcp.f32 %v1917_v59  ;;  %vm2075_vm15 = vmor %vm2073_vm14, %vm2074_vm13  ;;  %v2094_v10 = vand.u32 2147483648, %v1917_v59  ;;  %v2092_v22 = vand.u32 2147483647, %v1917_v59  ;;  %vm2088_vm2 = vweird.f32 %v1917_v59 }
 0x59c   : > { %v2070_v52 = vsub.f32 1.0, %v2069_v50 }
 0x59d   : > { %v2095_v37 = vor.u32 1.1754944e-38, %v2094_v10  ;;  %vm2093_vm5 = vcmp.eq.f32.partialorder %v2092_v22, 8.507059e+37 }
 0x59e   : > { %v2071_v62 = vmul.f32 %v3566_v54, %v2070_v52 }
 0x5a0   : > { %v2072_v57 = vadd.f32 %v3566_v54, %v2071_v62 }
 0x5a1   : > { %v3568_v47 = vpop.eup %3567 }
 0x5a2   : > { %v1920_v18 = vpop.xlane.xlu0 %1919  ;;  %v2076_v26 = vsel %vm2075_vm15, %v3566_v54, %v2072_v57  ;;  %v2084_v15 = vmul.f32 %v3568_v47, %v1917_v59  ;;  %vm2089_vm1 = vweird.f32 %v3568_v47 }
 0x5a3   : > { %3569 = vrcp.f32 %v1920_v18  ;;  %v2081_v20 = vsel %vm2078_vm0, %v2080_v19, %v2076_v26  ;;  %vm2090_vm3 = vmor %vm2088_vm2, %vm2089_vm1  ;;  %v2109_v33 = vand.u32 2147483648, %v1920_v18  ;;  %v2107_v41 = vand.u32 2147483647, %v1920_v18 }
 0x5a4   : > { %v2085_v45 = vsub.f32 1.0, %v2084_v15  ;;  %v2191_v63 = vmul.f32 %v4620_v42, %v2081_v20  ;;  %v2192_v51 = vmul.f32 %v4624_v39, %v2081_v20  ;;  %vm2103_vm8 = vweird.f32 %v1920_v18 }
 0x5a5   : > { %v2110_v43 = vor.u32 1.1754944e-38, %v2109_v33  ;;  %vm2108_vm10 = vcmp.eq.f32.partialorder %v2107_v41, 8.507059e+37 }
 0x5a6   : > { %v2086_v27 = vmul.f32 %v3568_v47, %v2085_v45  ;;  %2223 = vst [vmem:[%s3849_s16 + $0x90] sm:$0xff] %v2191_v63  ;;  %v2245_v25 = vpack.c.bf16 %v2191_v63, %v2189_v21  ;;  %v2246_v31 = vpack.c.bf16 %v2192_v51, %v2190_v14 }
 0x5a7   : > { %2224 = vst [vmem:[%s3849_s16 + $0x98] sm:$0xff] %v2192_v51 }
 0x5a8   : > { %2377 = vmatmul.bf16.gmra.mxu2 %v2245_v25  ;;  %2426 = vmatmul.bf16.gmra.mxu3 %v2246_v31  ;;  %v2087_v61 = vadd.f32 %v3568_v47, %v2086_v27 }
 0x5a9   : > { %v3570_v29 = vpop.eup %3569  ;;  %v2358_v46 = vpop.f32.mrf.mxu2 }
 0x5aa   : > { %v2099_v1 = vmul.f32 %v3570_v29, %v1920_v18  ;;  %v2407_v35 = vpop.f32.mrf.mxu3  ;;  %v1923_v39 = vpop.xlane.xlu1 %1922  ;;  %v2091_v32 = vsel %vm2090_vm3, %v3568_v47, %v2087_v61  ;;  %vm2104_vm7 = vweird.f32 %v3570_v29 }
 0x5ab   : > { %v2408_v42 = vadd.f32 %v2407_v35, %v2358_v46  ;;  %3571 = vrcp.f32 %v1923_v39  ;;  %v2096_v6 = vsel %vm2093_vm5, %v2095_v37, %v2091_v32  ;;  %vm2105_vm9 = vmor %vm2103_vm8, %vm2104_vm7  ;;  %v2124_v53 = vand.u32 2147483648, %v1923_v39 }
 0x5ac   : > { %v2100_v40 = vsub.f32 1.0, %v2099_v1  ;;  %v2193_v56 = vmul.f32 %v4636_v4, %v2096_v6  ;;  %v2194_v49 = vmul.f32 %v4641_v13, %v2096_v6  ;;  %v2122_v52 = vand.u32 2147483647, %v1923_v39 }
 0x5ad   : > { %v2447_v0 = vpack.c.bf16 %v2408_v42, %v2408_v42  ;;  %vm2118_vm12 = vweird.f32 %v1923_v39  ;;  %v2125_v26 = vor.u32 1.1754944e-38, %v2124_v53 }
 0x5ae   : > { %v2101_v23 = vmul.f32 %v3570_v29, %v2100_v40  ;;  %2225 = vst [vmem:[%s3849_s16 + $0xa0] sm:$0xff] %v2193_v56  ;;  %vm2123_vm14 = vcmp.eq.f32.partialorder %v2122_v52, 8.507059e+37 }
 0x5af   : > { %2466 = vst.msk [vmem:[%s4747_s18] sm:$0xf] %vm2465_vm4, %v2447_v0 }
 0x5b0   : > { %v2102_v58 = vadd.f32 %v3570_v29, %v2101_v23  ;;  %2226 = vst [vmem:[%s3849_s16 + $0xa8] sm:$0xff] %v2194_v49 }
 0x5b1   : > { %v3572_v28 = vpop.eup %3571  ;;  %v2360_v38 = vpop.f32.mrf.mxu2 }
 0x5b2   : > { %v2409_v60 = vpop.f32.mrf.mxu3  ;;  %v2106_v30 = vsel %vm2105_vm9, %v3570_v29, %v2102_v58  ;;  %v2114_v4 = vmul.f32 %v3572_v28, %v1923_v39  ;;  %v1926_v55 = vpop.xlane.xlu2 %1925  ;;  %vm2119_vm11 = vweird.f32 %v3572_v28 }
 0x5b3   : > { %v2410_v13 = vadd.f32 %v2409_v60, %v2360_v38  ;;  %v2111_v11 = vsel %vm2108_vm10, %v2110_v43, %v2106_v30  ;;  %3573 = vrcp.f32 %v1926_v55  ;;  %vm2120_vm13 = vmor %vm2118_vm12, %vm2119_vm11  ;;  %v2139_v10 = vand.u32 2147483648, %v1926_v55 }
 0x5b4   : > { %v2115_v16 = vsub.f32 1.0, %v2114_v4  ;;  %v2195_v21 = vmul.f32 %v4655_v2, %v2111_v11  ;;  %v2196_v14 = vmul.f32 %v4659_v24, %v2111_v11  ;;  %v2137_v27 = vand.u32 2147483647, %v1926_v55 }
 0x5b5   : > { %v2448_v17 = vpack.c.bf16 %v2410_v13, %v2410_v13  ;;  %vm2133_vm0 = vweird.f32 %v1926_v55  ;;  %v2140_v61 = vor.u32 1.1754944e-38, %v2139_v10 }
 0x5b6   : > { %v2116_v54 = vmul.f32 %v3572_v28, %v2115_v16  ;;  %v2247_v50 = vpack.c.bf16 %v2195_v21, %v2193_v56  ;;  %v2248_v59 = vpack.c.bf16 %v2196_v14, %v2194_v49  ;;  %2227 = vst [vmem:[%s3849_s16 + $0xb0] sm:$0xff] %v2195_v21  ;;  %vm2138_vm2 = vcmp.eq.f32.partialorder %v2137_v27, 8.507059e+37 }
 0x5b7   : > { %2467 = vst.msk [vmem:[%s4747_s18 + $0x4] sm:$0xf] %vm2465_vm4, %v2448_v17 }
 0x5b8   : > { %2382 = vmatmul.bf16.gmra.mxu2 %v2247_v50  ;;  %2228 = vst [vmem:[%s3849_s16 + $0xb8] sm:$0xff] %v2196_v14  ;;  %2431 = vmatmul.bf16.gmra.mxu3 %v2248_v59  ;;  %v2117_v62 = vadd.f32 %v3572_v28, %v2116_v54 }
 0x5b9   : > { %v3574_v3 = vpop.eup %3573  ;;  %v2363_v7 = vpop.f32.mrf.mxu2 }
 0x5ba   : > { %v2412_v57 = vpop.f32.mrf.mxu3  ;;  %v2129_v2 = vmul.f32 %v3574_v3, %v1926_v55  ;;  %v1929_v47 = vpop.xlane.xlu0 %1928  ;;  %v2121_v18 = vsel %vm2120_vm13, %v3572_v28, %v2117_v62  ;;  %vm2134_vm15 = vweird.f32 %v3574_v3 }
 0x5bb   : > { %v2413_v24 = vadd.f32 %v2412_v57, %v2363_v7  ;;  %3575 = vrcp.f32 %v1929_v47  ;;  %v2126_v20 = vsel %vm2123_vm14, %v2125_v26, %v2121_v18  ;;  %vm2135_vm1 = vmor %vm2133_vm0, %vm2134_vm15  ;;  %v2154_v32 = vand.u32 2147483648, %v1929_v47 }
 0x5bc   : > { %v2130_v19 = vsub.f32 1.0, %v2129_v2  ;;  %v2197_v45 = vmul.f32 %v4674_v5, %v2126_v20  ;;  %v2198_v63 = vmul.f32 %v4679_v9, %v2126_v20  ;;  %v2152_v0 = vand.u32 2147483647, %v1929_v47 }
 0x5bd   : > { %v2449_v15 = vpack.c.bf16 %v2413_v24, %v2413_v24  ;;  %vm2148_vm5 = vweird.f32 %v1929_v47  ;;  %v2155_v49 = vor.u32 1.1754944e-38, %v2154_v32 }
 0x5be   : > { %v2131_v51 = vmul.f32 %v3574_v3, %v2130_v19  ;;  %2229 = vst [vmem:[%s3849_s16 + $0xc0] sm:$0xff] %v2197_v45  ;;  %vm2153_vm8 = vcmp.eq.f32.partialorder %v2152_v0, 8.507059e+37 }
 0x5bf   : > { %2468 = vst.msk [vmem:[%s4747_s18 + $0x8] sm:$0xf] %vm2465_vm4, %v2449_v15 }
 0x5c0   : > { %v2132_v25 = vadd.f32 %v3574_v3, %v2131_v51  ;;  %2230 = vst [vmem:[%s3849_s16 + $0xc8] sm:$0xff] %v2198_v63 }
 0x5c1   : > { %v3576_v31 = vpop.eup %3575  ;;  %v2365_v22 = vpop.f32.mrf.mxu2 }
 0x5c2   : > { %v2414_v29 = vpop.f32.mrf.mxu3  ;;  %v2144_v1 = vmul.f32 %v3576_v31, %v1929_v47  ;;  %v1932_v9 = vpop.xlane.xlu1 %1931  ;;  %v2136_v46 = vsel %vm2135_vm1, %v3574_v3, %v2132_v25  ;;  %vm2149_vm3 = vweird.f32 %v3576_v31 }
 0x5c3   : > { %v2415_v5 = vadd.f32 %v2414_v29, %v2365_v22  ;;  %3577 = vrcp.f32 %v1932_v9  ;;  %v2141_v39 = vsel %vm2138_vm2, %v2140_v61, %v2136_v46  ;;  %vm2150_vm7 = vmor %vm2148_vm5, %vm2149_vm3  ;;  %v2169_v55 = vand.u32 2147483648, %v1932_v9 }
 0x5c4   : > { %v2145_v35 = vsub.f32 1.0, %v2144_v1  ;;  %v2199_v37 = vmul.f32 %v4693_v8, %v2141_v39  ;;  %v2200_v40 = vmul.f32 %v4697_v48, %v2141_v39  ;;  %v2167_v16 = vand.u32 2147483647, %v1932_v9 }
 0x5c5   : > { %v2450_v42 = vpack.c.bf16 %v2415_v5, %v2415_v5  ;;  %vm2163_vm10 = vweird.f32 %v1932_v9  ;;  %v2170_v21 = vor.u32 1.1754944e-38, %v2169_v55 }
 0x5c6   : > { %v2146_v33 = vmul.f32 %v3576_v31, %v2145_v35  ;;  %2231 = vst [vmem:[%s3849_s16 + $0xd0] sm:$0xff] %v2199_v37  ;;  %v2249_v6 = vpack.c.bf16 %v2199_v37, %v2197_v45  ;;  %v2250_v41 = vpack.c.bf16 %v2200_v40, %v2198_v63  ;;  %vm2168_vm12 = vcmp.eq.f32.partialorder %v2167_v16, 8.507059e+37 }
 0x5c7   : > { %2469 = vst.msk [vmem:[%s4747_s18 + $0xc] sm:$0xf] %vm2465_vm4, %v2450_v42 }
 0x5c8   : > { %v2147_v23 = vadd.f32 %v3576_v31, %v2146_v33  ;;  %2232 = vst [vmem:[%s3849_s16 + $0xd8] sm:$0xff] %v2200_v40  ;;  %2387 = vmatmul.bf16.gmra.mxu2 %v2249_v6  ;;  %2436 = vmatmul.bf16.gmra.mxu3 %v2250_v41 }
 0x5c9   : > { %v3578_v56 = vpop.eup %3577  ;;  %v2368_v8 = vpop.f32.mrf.mxu2 }
 0x5ca   : > { %v2417_v48 = vpop.f32.mrf.mxu3  ;;  %v2159_v58 = vmul.f32 %v3578_v56, %v1932_v9  ;;  %v2151_v28 = vsel %vm2150_vm7, %v3576_v31, %v2147_v23  ;;  %vm2164_vm9 = vweird.f32 %v3578_v56 }
 0x5cb   : > { %v2418_v43 = vadd.f32 %v2417_v48, %v2368_v8  ;;  %v2156_v38 = vsel %vm2153_vm8, %v2155_v49, %v2151_v28  ;;  %vm2165_vm11 = vmor %vm2163_vm10, %vm2164_vm9 }
 0x5cc   : > { %v2160_v60 = vsub.f32 1.0, %v2159_v58  ;;  %v2201_v4 = vmul.f32 %v4709_v44, %v2156_v38  ;;  %v2202_v13 = vmul.f32 %v4714_v12, %v2156_v38 }
 0x5cd   : > { %v2451_v30 = vpack.c.bf16 %v2418_v43, %v2418_v43 }
 0x5ce   : > { %v2161_v11 = vmul.f32 %v3578_v56, %v2160_v60  ;;  %2233 = vst [vmem:[%s3849_s16 + $0xe0] sm:$0xff] %v2201_v4 }
 0x5cf   : > { %2470 = vst.msk [vmem:[%s4747_s18 + $0x10] sm:$0xf] %vm2465_vm4, %v2451_v30 }
 0x5d0   : > { %v2162_v17 = vadd.f32 %v3578_v56, %v2161_v11  ;;  %2234 = vst [vmem:[%s3849_s16 + $0xe8] sm:$0xff] %v2202_v13 }
 0x5d1   : > { %v2370_v14 = vpop.f32.mrf.mxu2 }
 0x5d2   : > { %v2419_v53 = vpop.f32.mrf.mxu3  ;;  %v2166_v12 = vsel %vm2165_vm11, %v3578_v56, %v2162_v17 }
 0x5d3   : > { %v2420_v44 = vadd.f32 %v2419_v53, %v2370_v14  ;;  %v2171_v54 = vsel %vm2168_vm12, %v2170_v21, %v2166_v12 }
 0x5d4   : > { %v2203_v59 = vmul.f32 %v4724_v36, %v2171_v54  ;;  %v2204_v52 = vmul.f32 %v4726_v34, %v2171_v54 }
 0x5d5   : > { %v2452_v50 = vpack.c.bf16 %v2420_v44, %v2420_v44 }
 0x5d6   : > { %v2251_v62 = vpack.c.bf16 %v2203_v59, %v2201_v4  ;;  %v2252_v3 = vpack.c.bf16 %v2204_v52, %v2202_v13  ;;  %2235 = vst [vmem:[%s3849_s16 + $0xf0] sm:$0xff] %v2203_v59 }
 0x5d7   : > { %2471 = vst.msk [vmem:[%s4747_s18 + $0x14] sm:$0xf] %vm2465_vm4, %v2452_v50 }
 0x5d8   : > { %2236 = vst [vmem:[%s3849_s16 + $0xf8] sm:$0xff] %v2204_v52  ;;  %2392 = vmatmul.bf16.gmra.mxu2 %v2251_v62  ;;  %2441 = vmatmul.bf16.gmra.mxu3 %v2252_v3 }
 0x5d9   : > { %v2373_v7 = vpop.f32.mrf.mxu2 }
 0x5da   : > { %v2422_v57 = vpop.f32.mrf.mxu3 }
 0x5db   : > { %v2423_v2 = vadd.f32 %v2422_v57, %v2373_v7 }
 0x5dd   : > { %v2453_v24 = vpack.c.bf16 %v2423_v2, %v2423_v2 }
 0x5df   : > { %2472 = vst.msk [vmem:[%s4747_s18 + $0x18] sm:$0xf] %vm2465_vm4, %v2453_v24 }
 0x5e1   : > { %v2375_v36 = vpop.f32.mrf.mxu2 }
 0x5e2   : > { %v2424_v47 = vpop.f32.mrf.mxu3 }
 0x5e3   : > { %v2425_v34 = vadd.f32 %v2424_v47, %v2375_v36 }
 0x5e5   : > { %v2454_v18 = vpack.c.bf16 %v2425_v34, %v2425_v34 }
 0x5e7   : > { %2473 = vst.msk [vmem:[%s4747_s18 + $0x1c] sm:$0xf] %vm2465_vm4, %v2454_v18 }
 0x62b   : > { %v2378_v26 = vpop.f32.mrf.mxu2  ;;  %v2427_v19 = vpop.f32.mrf.mxu3 }
 0x62c   : > { %v2428_v15 = vadd.f32 %v2427_v19, %v2378_v26 }
 0x62e   : > { %v2455_v20 = vpack.c.bf16 %v2428_v15, %v2428_v15 }
 0x630   : > { %2474 = vst.msk [vmem:[%s4747_s18 + $0x20] sm:$0xf] %vm2465_vm4, %v2455_v20 }
 0x633   : > { %v2380_v45 = vpop.f32.mrf.mxu2  ;;  %v2429_v63 = vpop.f32.mrf.mxu3 }
 0x634   : > { %v2430_v51 = vadd.f32 %v2429_v63, %v2380_v45 }
 0x636   : > { %v2456_v10 = vpack.c.bf16 %v2430_v51, %v2430_v51 }
 0x638   : > { %2475 = vst.msk [vmem:[%s4747_s18 + $0x24] sm:$0xf] %vm2465_vm4, %v2456_v10 }
 0x63b   : > { %v2383_v27 = vpop.f32.mrf.mxu2  ;;  %v2432_v25 = vpop.f32.mrf.mxu3 }
 0x63c   : > { %v2433_v31 = vadd.f32 %v2432_v25, %v2383_v27 }
 0x63e   : > { %v2457_v22 = vpack.c.bf16 %v2433_v31, %v2433_v31 }
 0x640   : > { %2476 = vst.msk [vmem:[%s4747_s18 + $0x28] sm:$0xf] %vm2465_vm4, %v2457_v22 }
 0x643   : > { %v2385_v29 = vpop.f32.mrf.mxu2  ;;  %v2434_v61 = vpop.f32.mrf.mxu3 }
 0x644   : > { %v2435_v1 = vadd.f32 %v2434_v61, %v2385_v29 }
 0x646   : > { %v2458_v5 = vpack.c.bf16 %v2435_v1, %v2435_v1 }
 0x648   : > { %2477 = vst.msk [vmem:[%s4747_s18 + $0x2c] sm:$0xf] %vm2465_vm4, %v2458_v5 }
 0x64b   : > { %v2388_v9 = vpop.f32.mrf.mxu2  ;;  %v2437_v46 = vpop.f32.mrf.mxu3 }
 0x64c   : > { %v2438_v35 = vadd.f32 %v2437_v46, %v2388_v9 }
 0x64e   : > { %v2459_v42 = vpack.c.bf16 %v2438_v35, %v2438_v35 }
 0x650   : > { %2478 = vst.msk [vmem:[%s4747_s18 + $0x30] sm:$0xf] %vm2465_vm4, %v2459_v42 }
 0x653   : > { %v2390_v39 = vpop.f32.mrf.mxu2  ;;  %v2439_v32 = vpop.f32.mrf.mxu3 }
 0x654   : > { %v2440_v37 = vadd.f32 %v2439_v32, %v2390_v39 }
 0x656   : > { %v2460_v40 = vpack.c.bf16 %v2440_v37, %v2440_v37 }
 0x658   : > { %2479 = vst.msk [vmem:[%s4747_s18 + $0x34] sm:$0xf] %vm2465_vm4, %v2460_v40 }
 0x65b   : > { %v2393_v33 = vpop.f32.mrf.mxu2  ;;  %v2442_v0 = vpop.f32.mrf.mxu3 }
 0x65c   : > { %v2443_v6 = vadd.f32 %v2442_v0, %v2393_v33 }
 0x65e   : > { %v2461_v41 = vpack.c.bf16 %v2443_v6, %v2443_v6 }
 0x660   : > { %2480 = vst.msk [vmem:[%s4747_s18 + $0x38] sm:$0xf] %vm2465_vm4, %v2461_v41 }
 0x663   : > { %v2395_v23 = vpop.f32.mrf.mxu2  ;;  %v2444_v56 = vpop.f32.mrf.mxu3 }
 0x664   : > { %v2445_v49 = vadd.f32 %v2444_v56, %v2395_v23  ;;  %2485 = sbr.rel (%p3211_p6) target bundleno = 1931 (0x78b), region = 60 }
 0x666   : > { %v2462_v8 = vpack.c.bf16 %v2445_v49, %v2445_v49 }
 0x668   : > { %2481 = vst.msk [vmem:[%s4747_s18 + $0x3c] sm:$0xf] %vm2465_vm4, %v2462_v8 }
 0x669   : > { %vm2661_vm13 = vcmask 1043456   ;;  %v2639_v28 = vld [vmem:[%s4916_s5] sm:$0xf]  ;;  %vm2644_vm4 = vcmask 64512  }
 0x66a   : > { %v2663_v38 = vsel %vm2661_vm13, %v2639_v28, 0  ;;  %v3579_v15 = vld [vmem:[%s4917_s6] ss:$0 sm:$0xff] }
 0x66b   : > { %2672 = vmatpush.bf16.msra.mxu0 %v2663_v38  ;;  %3385 = vmatpush.bf16.msra.mxu2 %v2663_v38 }
 0x66c   : > { %3384 = vmatpush.bf16.msra.mxu1 %v2663_v38  ;;  %3386 = vmatpush.bf16.msra.mxu3 %v2663_v38 }
 0x66f   : > { %v3373_v48 = vld [vmem:[#allocation5 + $0x60] sm:$0xff]  ;;  %v3374_v43 = vld [vmem:[#allocation5 + $0x68] sm:$0xff]  ;;  %v3375_v60 = vld [vmem:[#allocation5 + $0x70] sm:$0xff] }
 0x670   : > { %v3369_v58 = vld [vmem:[#allocation5 + $0x40] sm:$0xff]  ;;  %2607 = vrot.lane.b32.xlu0 %v3373_v48, %s3696_s23  ;;  %2609 = vrot.lane.b32.xlu2 %v3374_v43, %s3696_s23  ;;  %v3371_v30 = vld [vmem:[#allocation5 + $0x50] sm:$0xff]  ;;  %v3376_v4 = vld [vmem:[#allocation5 + $0x78] sm:$0xff] }
 0x671   : > { %2599 = vrot.lane.b32.xlu1 %v3369_v58, %s3696_s23  ;;  %v3370_v13 = vld [vmem:[#allocation5 + $0x48] sm:$0xff]  ;;  %v3372_v55 = vld [vmem:[#allocation5 + $0x58] sm:$0xff]  ;;  %v3365_v11 = vld [vmem:[#allocation5 + $0x20] sm:$0xff] }
 0x672   : > { %v3361_v16 = vld [vmem:[#allocation5] sm:$0xff]  ;;  %v3367_v44 = vld [vmem:[#allocation5 + $0x30] sm:$0xff]  ;;  %v3366_v3 = vld [vmem:[#allocation5 + $0x28] sm:$0xff] }
 0x673   : > { %v3363_v12 = vld [vmem:[#allocation5 + $0x10] sm:$0xff]  ;;  %v3362_v7 = vld [vmem:[#allocation5 + $0x8] sm:$0xff]  ;;  %v3368_v36 = vld [vmem:[#allocation5 + $0x38] sm:$0xff] }
 0x674   : > { %v3364_v47 = vld [vmem:[#allocation5 + $0x18] sm:$0xff] }
 0x678   : > { %2611 = vrot.lane.b32.xlu0 %v3375_v60, %s3696_s23  ;;  %2613 = vrot.lane.b32.xlu2 %v3376_v4, %s3696_s23 }
 0x679   : > { %2603 = vrot.lane.b32.xlu1 %v3371_v30, %s3696_s23 }
 0x680   : > { %2601 = vrot.lane.b32.xlu0 %v3370_v13, %s3696_s23 }
 0x681   : > { %2605 = vrot.lane.b32.xlu1 %v3372_v55, %s3696_s23 }
 0x6ca   : > { %v2610_v62 = vpop.permute.xlu2 %2609 }
 0x6cb   : > { %v2632_v57 = vsel %vm1570_vm6, %v3366_v3, %v2610_v62 }
 0x6d2   : > { %v2614_v34 = vpop.permute.xlu2 %2613 }
 0x6d3   : > { %v2638_v26 = vsel %vm1570_vm6, %v3368_v36, %v2614_v34 }
 0x6e2   : > { %v2608_v17 = vpop.permute.xlu0 %2607 }
 0x6e3   : > { %v2600_v21 = vpop.permute.xlu1 %2599  ;;  %v2629_v14 = vsel %vm1570_vm6, %v3365_v11, %v2608_v17 }
 0x6e4   : > { %v2617_v53 = vsel %vm1570_vm6, %v3361_v16, %v2600_v21  ;;  %3280 = vmatmul.msk.bf16.vlgmr.msra.gmra.mxu2 %vm2644_vm4, %v2629_v14 }
 0x6e5   : > { %3276 = vmatmul.msk.bf16.vlgmr.msra.gmra.mxu0 %vm2644_vm4, %v2617_v53 }
 0x6ea   : > { %v2612_v54 = vpop.permute.xlu0 %2611 }
 0x6eb   : > { %v2604_v50 = vpop.permute.xlu1 %2603  ;;  %v2635_v59 = vsel %vm1570_vm6, %v3367_v44, %v2612_v54 }
 0x6ec   : > { %v2623_v52 = vsel %vm1570_vm6, %v3363_v12, %v2604_v50  ;;  %3282 = vmatmul.msk.bf16.vlgmr.msra.gmra.mxu3 %vm2644_vm4, %v2635_v59 }
 0x6ed   : > { %3278 = vmatmul.msk.bf16.vlgmr.msra.gmra.mxu1 %vm2644_vm4, %v2623_v52 }
 0x6f2   : > { %v2602_v2 = vpop.permute.xlu0 %2601 }
 0x6f3   : > { %v2620_v24 = vsel %vm1570_vm6, %v3362_v7, %v2602_v2  ;;  %v2606_v18 = vpop.permute.xlu1 %2605 }
 0x6f4   : > { %3281 = vmatmul.msk.bf16.gmra.mxu2 %vm2644_vm4, %v2632_v57  ;;  %v2626_v19 = vsel %vm1570_vm6, %v3364_v47, %v2606_v18 }
 0x6f5   : > { %3277 = vmatmul.msk.bf16.gmra.mxu0 %vm2644_vm4, %v2620_v24 }
 0x6fc   : > { %3283 = vmatmul.msk.bf16.gmra.mxu3 %vm2644_vm4, %v2638_v26 }
 0x6fd   : > { %3279 = vmatmul.msk.bf16.gmra.mxu1 %vm2644_vm4, %v2626_v19 }
 0x762   : > { %v2674_v20 = vpop.f32.mrf.mxu0 }
 0x763   : > { %v2675_v45 = vadd.f32 %v3579_v15, %v2674_v20 }
 0x765   : > { %2714 = vst.msk [vmem:[%s3846_s29] sm:$0xff] %vm2644_vm4, %v2675_v45 }
 0x767   : > { %v2694_v63 = vpop.f32.mrf.mxu2 }
 0x768   : > { %v2695_v51 = vadd.f32 %v3579_v15, %v2694_v63 }
 0x76a   : > { %v2676_v10 = vpop.f32.mrf.mxu0  ;;  %v2684_v27 = vpop.f32.mrf.mxu1  ;;  %2722 = vst.msk [vmem:[%s3846_s29 + $0x40] sm:$0xff] %vm2644_vm4, %v2695_v51 }
 0x76b   : > { %v2677_v25 = vadd.f32 %v3579_v15, %v2676_v10  ;;  %v2685_v31 = vadd.f32 %v3579_v15, %v2684_v27 }
 0x76d   : > { %2715 = vst.msk [vmem:[%s3846_s29 + $0x8] sm:$0xff] %vm2644_vm4, %v2677_v25 }
 0x76e   : > { %2718 = vst.msk [vmem:[%s3846_s29 + $0x20] sm:$0xff] %vm2644_vm4, %v2685_v31 }
 0x76f   : > { %v2696_v22 = vpop.f32.mrf.mxu2  ;;  %v2704_v29 = vpop.f32.mrf.mxu3 }
 0x770   : > { %v2697_v61 = vadd.f32 %v3579_v15, %v2696_v22  ;;  %v2705_v1 = vadd.f32 %v3579_v15, %v2704_v29 }
 0x772   : > { %v2686_v5 = vpop.f32.mrf.mxu1  ;;  %v2679_v9 = vpop.f32.mrf.mxu0  ;;  %2723 = vst.msk [vmem:[%s3846_s29 + $0x48] sm:$0xff] %vm2644_vm4, %v2697_v61 }
 0x773   : > { %v2687_v46 = vadd.f32 %v3579_v15, %v2686_v5  ;;  %v2680_v35 = vadd.f32 %v3579_v15, %v2679_v9  ;;  %2726 = vst.msk [vmem:[%s3846_s29 + $0x60] sm:$0xff] %vm2644_vm4, %v2705_v1 }
 0x775   : > { %2719 = vst.msk [vmem:[%s3846_s29 + $0x28] sm:$0xff] %vm2644_vm4, %v2687_v46 }
 0x776   : > { %2716 = vst.msk [vmem:[%s3846_s29 + $0x10] sm:$0xff] %vm2644_vm4, %v2680_v35 }
 0x777   : > { %v2699_v42 = vpop.f32.mrf.mxu2  ;;  %v2706_v39 = vpop.f32.mrf.mxu3 }
 0x778   : > { %v2700_v32 = vadd.f32 %v3579_v15, %v2699_v42  ;;  %v2707_v37 = vadd.f32 %v3579_v15, %v2706_v39 }
 0x77a   : > { %v2689_v40 = vpop.f32.mrf.mxu1  ;;  %v2681_v33 = vpop.f32.mrf.mxu0  ;;  %2724 = vst.msk [vmem:[%s3846_s29 + $0x50] sm:$0xff] %vm2644_vm4, %v2700_v32 }
 0x77b   : > { %v2690_v0 = vadd.f32 %v3579_v15, %v2689_v40  ;;  %v2682_v6 = vadd.f32 %v3579_v15, %v2681_v33  ;;  %2727 = vst.msk [vmem:[%s3846_s29 + $0x68] sm:$0xff] %vm2644_vm4, %v2707_v37 }
 0x77d   : > { %2720 = vst.msk [vmem:[%s3846_s29 + $0x30] sm:$0xff] %vm2644_vm4, %v2690_v0 }
 0x77e   : > { %2717 = vst.msk [vmem:[%s3846_s29 + $0x18] sm:$0xff] %vm2644_vm4, %v2682_v6 }
 0x77f   : > { %v2701_v41 = vpop.f32.mrf.mxu2  ;;  %v2709_v23 = vpop.f32.mrf.mxu3 }
 0x780   : > { %v2702_v56 = vadd.f32 %v3579_v15, %v2701_v41  ;;  %v2710_v49 = vadd.f32 %v3579_v15, %v2709_v23 }
 0x782   : > { %v2691_v8 = vpop.f32.mrf.mxu1  ;;  %2725 = vst.msk [vmem:[%s3846_s29 + $0x58] sm:$0xff] %vm2644_vm4, %v2702_v56 }
 0x783   : > { %v2692_v48 = vadd.f32 %v3579_v15, %v2691_v8  ;;  %2728 = vst.msk [vmem:[%s3846_s29 + $0x70] sm:$0xff] %vm2644_vm4, %v2710_v49 }
 0x785   : > { %2721 = vst.msk [vmem:[%s3846_s29 + $0x38] sm:$0xff] %vm2644_vm4, %v2692_v48 }
 0x787   : > { %v2711_v58 = vpop.f32.mrf.mxu3 }
 0x788   : > { %v2712_v43 = vadd.f32 %v3579_v15, %v2711_v58 }
 0x78a   : > { %2729 = vst.msk [vmem:[%s3846_s29 + $0x78] sm:$0xff] %vm2644_vm4, %v2712_v43 }
 0x78b PF: > { %s3377_s15 = sshll.u32 %s3670_s9, 5  ;;  %s3288_s11 = sshll.u32 %s3674_s10, 7 }
 0x78c   : > { %s2756_s22 = sadd.s32 %s3377_s15, %s4430_s17  ;;  %s2761_s13 = sshll.u32 %s3849_s16, 4  ;;  %s2762_s13 = int_to_ptr.vmem [resolvable:$true] %s2761_s13 }
 0x78d   : > { %s2758_s12 = sadd.s32 %s3288_s11, %s2756_s22  ;;  %s4940_s29 = sand.u32 1, %s3658_s28  }
 0x78e   : > { %s3289_s19 = sshll.u32 %s2758_s12, 3  ;;  %s2740_s25 = scalar_lea.sflag [#allocation7], %s4940_s29 }
 0x78f   : > { %s2760_s23 = scalar_lea.hbm %s4919_s8, %s3289_s19  ;;  %s3600_s16 = scalar_lea.hbm %s4919_s8, 2048 }
 0x790   : > { %s2763_s24 = sshll.u32 %s2760_s23, 4  ;;  %s2764_s24 = int_to_ptr.hbm [resolvable:$true] %s2763_s24 }
 0x791   : > { %s3594_s30 = sshra.s32 %s2764_s24, 4  ;;  %s3595_s30 = int_to_ptr.hbm [resolvable:$true] %s3594_s30 }
 0x792   : > { %s3596_s26 = scalar_lea.hbm %s3595_s30, 256  ;;  %p3601_p11 = scmp.lt.s32.totalorder %s3595_s30, %s4919_s8 }
 0x793   : > { %p3597_p8 = scmp.ne.s32.totalorder %s3595_s30, %s3596_s26  ;;  %p3602_p12 = scmp.lt.s32.totalorder %s3600_s16, %s3596_s26 }
 0x795   : > { %p3598_p9 = pnand %p3597_p8, %p3806_p5  ;;  %p3603_p13 = por %p3602_p12, %p3601_p11 }
 0x797   : > { %p3599_p10 = pneg %p3598_p9 }
 0x799   : > { %p3604_p0 = pnand %p3603_p13, %p3599_p10 }
 0x79b   : > { %3607 = shalt.err (!%p3604_p0)
}
 0x79c   : > { %s3697_s22 = smov 256   ;;  %s3698_s11 = smov 16  }
 0x79d   : > { %3387 = dma.vmem_to_hbm [thread:$0]  (%p3806_p5), %s2762_s13, 4096, %s2764_s24, %s2740_s25, %s3697_s22, %s3697_s22, %s3698_s11  }
 0x79e PF: > { %p3393_p1 = scmp.ge.s32.totalorder %s3690_s14, 2  ;;  %s2790_s19 = sand.u32 1, %s3654_s27  }
 0x79f   : > { %s2791_s21 = scalar_lea.sflag [#allocation7], %s2790_s19 }
 0x7a0   : > { %p3390_p2 = pnand %p3393_p1, %p3813_p7 }
 0x7a2   : > { %p3391_p3 = pneg %p3390_p2 }
 0x7a4   : > { %3649 = dma.done.wait (%p3391_p3), %s2791_s21, 4096  }
 0x7a5   : > { %3651 = vsyncadd (%p3391_p3), %s2791_s21, 4294963200  ;;  %s22_s14 = sadd.s32 1, %s3690_s14   ;;  %s4942_s18 = sld [smem:[#allocation9_spill]] }
 0x7a6   : > { %p19_p4 = scmp.ge.s32.totalorder %s22_s14, 10   ;;  %s4943_s29 = sld [smem:[#allocation17_spill]] }
 0x7a7   : > { %s4944_s30 = sld [smem:[#allocation10_spill]]  ;;  %s4950_s27 = smov %s3658_s28 }
 0x7a8   : > { %s4945_s9 = sld [smem:[#allocation11_spill]]  ;;  %21 = sbr.rel (!%p19_p4) target bundleno = 6 (0x6), region = 116 }
 0x7a9   : > { %s4946_s10 = sld [smem:[#allocation12_spill]] }
 0x7aa   : > { %s4947_s11 = sld [smem:[#allocation13_spill]] }
 0x7ab   : > { %s4948_s12 = sld [smem:[#allocation14_spill]]  ;;  %s4951_s28 = smov %s4942_s18 }
 0x7ac   : > { %s4949_s13 = sld [smem:[#allocation16_spill]] }
 0x7ad   :  { %2797 = vsyncpa [#allocation7], 1 }
 0x7ae   :  { %2799 = vsyncpa [#allocation7 + $0x1], 1 }

</bundles_post_ra>
